<compile_context>
chip_gen: v5e
topology: v5e:2x2
jax: 0.10.0
libtpu: 0.0.40
codegen_flags: <defaults>
</compile_context>

<pallas_src>
import functools

import numpy as np
import jax
import jax.numpy as jnp
from jax.experimental import pallas as pl
from jax.experimental.pallas import tpu as pltpu


# ----------------------------------------------------------------------------
# in-kernel helpers
# ----------------------------------------------------------------------------

def _elu(x):
    return jnp.where(x > 0, x, jnp.exp(jnp.minimum(x, 0.0)) - 1.0)


def _layer_norm(x, gamma, beta, eps=1e-6):          # nn.LayerNorm(eps=1e-06)
    mu = jnp.mean(x, axis=-1, keepdims=True)
    var = jnp.mean((x - mu) ** 2, axis=-1, keepdims=True)
    return (x - mu) * jax.lax.rsqrt(var + eps) * gamma + beta


def _softmax_rows(e):
    e = e - jnp.max(e, axis=-1, keepdims=True)
    p = jnp.exp(e)
    return p * pl.reciprocal(jnp.sum(p, axis=-1, keepdims=True), approx=True)


# ----------------------------------------------------------------------------
# the fused EncoderLayer kernel (one grid step == one graph / batch element)
# ----------------------------------------------------------------------------

def _encoder_layer_kernel(
        enc_ref, adj_ref,
        p1w_ref, p1s_ref, p1d_ref, p1b_ref,
        p2w_ref, p2s_ref, p2d_ref, p2b_ref,
        p3w_ref, p3s_ref, p3d_ref, p3b_ref,
        wqkv_ref, fc_ref, ln1g_ref, ln1b_ref,
        w1_ref, b1_ref, w2_ref, b2_ref, ln2g_ref, ln2b_ref,
        out_ref, attn_ref,
        *, heads, n_head, d_k, d_v, pine_hidden):
    f32 = jnp.float32
    x0 = enc_ref[0]                                   # (L, D)  residual / input
    edge_mask = adj_ref[0] > 0.0                      # (L, L)  [dst, src], self loops incl.
    neg_big = f32(-1e30)

    def gat_plus_lin(x, pw_ref, asrc_ref, adst_ref, pb_ref, C, concat):
        """GATConv(x) + Linear(x) + (gat_bias + lin_bias), heads fused."""
        HC = heads * C
        # one wide matmul: [W_gat (HC cols) | W_lin] — lane dense
        proj = jnp.dot(x, pw_ref[...], preferred_element_type=f32)      # (L, HC+lin)
        wh = proj[:, :HC]                                               # (L, HC)
        lin_out = proj[:, HC:]                                          # (L, lin)
        # per-node, per-head attention coefficients (a_src / a_dst folded weights)
        dcols = jnp.dot(x, adst_ref[...], preferred_element_type=f32)   # (L, H)
        head_ids = jax.lax.broadcasted_iota(jnp.int32, (1, heads), 1)
        col_ids = jax.lax.broadcasted_iota(jnp.int32, (1, HC), 1)
        acc = None
        for h in range(heads):                        # static, tiny (heads == 2)
            dst_col = jnp.sum(dcols * (head_ids == h).astype(f32),
                              axis=-1, keepdims=True)                   # (L, 1)
            src_row = jax.lax.dot_general(                              # (1, L)
                asrc_ref[h:h + 1, :], x, (((1,), (1,)), ((), ())),
                preferred_element_type=f32)
            e = dst_col + src_row                      # e[i,j] = a_dst_i + a_src_j
            e = jnp.where(e > 0, e, 0.2 * e)           # LeakyReLU(0.2)
            e = jnp.where(edge_mask, e, neg_big)       # only edges j -> i
            p = _softmax_rows(e)                       # (L, L)
            if concat:
                oh = jnp.dot(p, wh, preferred_element_type=f32)         # (L, HC)
                cmask = jnp.logical_and(col_ids >= h * C,
                                        col_ids < (h + 1) * C).astype(f32)
                term = oh * cmask                      # keep head-h column block
            else:
                oh = jnp.dot(p, wh[:, h * C:(h + 1) * C],
                             preferred_element_type=f32)                # (L, C)
                term = oh
            acc = term if acc is None else acc + term
        gat_out = acc if concat else acc * (1.0 / heads)
        return gat_out + lin_out + pb_ref[...]

    # ---- PINE (GAT) branch: conv1+lin1 -> ELU -> conv2+lin2 -> ELU -> conv3+lin3
    xp = _elu(gat_plus_lin(x0, p1w_ref, p1s_ref, p1d_ref, p1b_ref, pine_hidden, True))
    xp = _elu(gat_plus_lin(xp, p2w_ref, p2s_ref, p2d_ref, p2b_ref, pine_hidden, True))
    xp = gat_plus_lin(xp, p3w_ref, p3s_ref, p3d_ref, p3b_ref, heads * d_k, False)

    # ---- multi-head self attention (fused Q|K|V projection, bias-free) ----
    qkv = jnp.dot(x0, wqkv_ref[...], preferred_element_type=f32)        # (L, nH*(2dk+dv))
    inv_t = 1.0 / (float(d_k) ** 0.5)
    k_off = n_head * d_k
    v_off = 2 * n_head * d_k
    fcw = fc_ref[...]                                                   # (pineW + nH*dv, D)
    pine_w = heads * d_k
    # fc(concat([pine, attn])) == pine @ fc[:pine_w] + sum_h attn_h @ fc[slice_h]
    y = jnp.dot(xp, fcw[:pine_w, :], preferred_element_type=f32) + x0   # + residual
    for h in range(n_head):                          # static, tiny (n_head == 2)
        qh = qkv[:, h * d_k:(h + 1) * d_k] * inv_t
        kh = qkv[:, k_off + h * d_k:k_off + (h + 1) * d_k]
        vh = qkv[:, v_off + h * d_v:v_off + (h + 1) * d_v]
        s = jax.lax.dot_general(qh, kh, (((1,), (1,)), ((), ())),
                                preferred_element_type=f32)             # (L, L)
        p = _softmax_rows(s)
        attn_ref[0, h] = p                           # returned attention weights
        oh = jnp.dot(p, vh, preferred_element_type=f32)                 # (L, d_v)
        frow = fcw[pine_w + h * d_v:pine_w + (h + 1) * d_v, :]          # (d_v, D)
        y = y + jnp.dot(oh, frow, preferred_element_type=f32)
    y = _layer_norm(y, ln1g_ref[...], ln1b_ref[...])

    # ---- position-wise feed-forward: LN(x + W2 relu(W1 x + b1) + b2) ----
    hid = jnp.maximum(
        jnp.dot(y, w1_ref[...], preferred_element_type=f32) + b1_ref[...], 0.0)
    z = jnp.dot(hid, w2_ref[...], preferred_element_type=f32) + b2_ref[...] + y
    out_ref[0] = _layer_norm(z, ln2g_ref[...], ln2b_ref[...])


# ----------------------------------------------------------------------------
# wrapper
# ----------------------------------------------------------------------------

_WEIGHT_NAMES = ['p1_w', 'p1_s', 'p1_d', 'p1_b',
                 'p2_w', 'p2_s', 'p2_d', 'p2_b',
                 'p3_w', 'p3_s', 'p3_d', 'p3_b',
                 'wqkv', 'fc', 'ln1_g', 'ln1_b',
                 'w1', 'b1', 'w2', 'b2', 'ln2_g', 'ln2_b']


def encoder_layer_forward(params, enc_input, adj, *, pine_heads=2, pine_hidden=16,
                          n_head=2, d_k=16, d_v=16):
    """EncoderLayer forward: returns (enc_output [B,L,D], attn [B,n_head,L,L])."""
    B, L, D = enc_input.shape
    weights = [params[n].astype(jnp.float32) for n in _WEIGHT_NAMES]

    kernel = functools.partial(_encoder_layer_kernel, heads=pine_heads,
                               n_head=n_head, d_k=d_k, d_v=d_v,
                               pine_hidden=pine_hidden)

    weight_specs = [pl.BlockSpec(w.shape, lambda b: (0, 0)) for w in weights]

    out, attn = pl.pallas_call(
        kernel,
        out_shape=(jax.ShapeDtypeStruct((B, L, D), jnp.float32),
                   jax.ShapeDtypeStruct((B, n_head, L, L), jnp.float32)),
        grid=(B,),
        in_specs=[pl.BlockSpec((1, L, D), lambda b: (b, 0, 0)),
                  pl.BlockSpec((1, L, L), lambda b: (b, 0, 0))] + weight_specs,
        out_specs=(pl.BlockSpec((1, L, D), lambda b: (b, 0, 0)),
                   pl.BlockSpec((1, n_head, L, L), lambda b: (b, 0, 0, 0))),
        compiler_params=pltpu.CompilerParams(
            dimension_semantics=("parallel",)),        # batch axis -> both TCs on v7x
    )(enc_input.astype(jnp.float32), adj.astype(jnp.float32), *weights)
    return out, attn


# ----------------------------------------------------------------------------
# deterministic synthetic parameters (weights pre-folded for the fused kernel)
# ----------------------------------------------------------------------------

def _fold_gat_lin(gat, lin_w, lin_b, heads, out_ch):
    """Fold GATConv weights + parallel Linear into kernel-ready arrays."""
    gw = gat['w']                                      # [Fin, H*C]
    fin = gw.shape[0]
    gw3 = gw.reshape(fin, heads, out_ch)
    pw = jnp.concatenate([gw, lin_w], axis=1)          # [Fin, H*C + lin_out]
    asrc = jnp.einsum('fhc,hc->hf', gw3, gat['a_src'])  # [H, Fin]
    adst = jnp.einsum('fhc,hc->fh', gw3, gat['a_dst'])  # [Fin, H]
    pb = (gat['bias'] + lin_b).reshape(1, -1)          # combined biases
    return pw, asrc, adst, pb


def init_encoder_layer_params(key, *, d_model, d_inner, d_k, d_v,
                              pine_hidden, pine_heads, n_head):
    ks = list(jax.random.split(key, 20))

    def dense(k, fin, fout):
        return jax.random.normal(k, (fin, fout), jnp.float32) / float(fin) ** 0.5

    def vec(k, n, scale=0.01):
        return jax.random.normal(k, (n,), jnp.float32) * scale

    def gat_raw(k, fin, out_ch, hh, concat):
        k1, k2, k3, k4 = jax.random.split(k, 4)
        return dict(w=dense(k1, fin, hh * out_ch),
                    a_src=jax.random.normal(k2, (hh, out_ch), jnp.float32) * 0.1,
                    a_dst=jax.random.normal(k3, (hh, out_ch), jnp.float32) * 0.1,
                    bias=vec(k4, hh * out_ch if concat else out_ch))

    H, Ch = pine_heads, pine_hidden
    out3 = pine_heads * d_k

    p1_w, p1_s, p1_d, p1_b = _fold_gat_lin(
        gat_raw(ks[0], d_model, Ch, H, True),
        dense(ks[1], d_model, H * Ch), vec(ks[2], H * Ch), H, Ch)
    p2_w, p2_s, p2_d, p2_b = _fold_gat_lin(
        gat_raw(ks[3], H * Ch, Ch, H, True),
        dense(ks[4], H * Ch, H * Ch), vec(ks[5], H * Ch), H, Ch)
    p3_w, p3_s, p3_d, p3_b = _fold_gat_lin(
        gat_raw(ks[6], H * Ch, out3, H, False),
        dense(ks[7], H * Ch, out3), vec(ks[8], out3), H, out3)

    wqkv = jnp.concatenate([dense(ks[9], d_model, n_head * d_k),    # w_qs
                            dense(ks[10], d_model, n_head * d_k),   # w_ks
                            dense(ks[11], d_model, n_head * d_v)],  # w_vs
                           axis=1)                                  # bias=False
    fc = dense(ks[12], (n_head + pine_heads) * d_v, d_model)        # bias=False

    return dict(
        p1_w=p1_w, p1_s=p1_s, p1_d=p1_d, p1_b=p1_b,
        p2_w=p2_w, p2_s=p2_s, p2_d=p2_d, p2_b=p2_b,
        p3_w=p3_w, p3_s=p3_s, p3_d=p3_d, p3_b=p3_b,
        wqkv=wqkv, fc=fc,
        ln1_g=jnp.ones((1, d_model), jnp.float32),
        ln1_b=jnp.zeros((1, d_model), jnp.float32),
        w1=dense(ks[13], d_model, d_inner),
        b1=vec(ks[14], d_inner).reshape(1, -1),
        w2=dense(ks[15], d_inner, d_model),
        b2=vec(ks[16], d_model).reshape(1, -1),
        ln2_g=jnp.ones((1, d_model), jnp.float32),
        ln2_b=jnp.zeros((1, d_model), jnp.float32),
    )


# ----------------------------------------------------------------------------
# main
# ----------------------------------------------------------------------------

if __name__ == "__main__":
    # NAS-Bench-101-like small shapes: 7 nodes per cell
    B, L = 2, 7
    d_model, d_inner = 32, 64
    d_k = d_v = 16
    pine_hidden, pine_heads, n_head = 16, 2, 2

    key = jax.random.PRNGKey(0)
    kp, kx = jax.random.split(key)
    params = init_encoder_layer_params(
        kp, d_model=d_model, d_inner=d_inner, d_k=d_k, d_v=d_v,
        pine_hidden=pine_hidden, pine_heads=pine_heads, n_head=n_head)

    enc_input = jax.random.normal(kx, (B, L, d_model), jnp.float32)

    # TODO(synk): variable num_nodes / torch_geometric.Batch not supported; every
    # graph uses L nodes and edge_index is encoded as a dense adjacency
    # adj[b, dst, src] with self-loops (GATConv add_self_loops=True).
    edges = [
        [(0, 1), (0, 2), (1, 3), (2, 3), (3, 4), (4, 5), (5, 6), (0, 6)],
        [(0, 1), (1, 2), (2, 3), (3, 4), (4, 5), (5, 6), (0, 3), (2, 6)],
    ]
    adj_np = np.zeros((B, L, L), dtype=np.float32)
    for b in range(B):
        for s, d in edges[b]:
            adj_np[b, d, s] = 1.0
        for n in range(L):
            adj_np[b, n, n] = 1.0
    adj = jnp.asarray(adj_np)

    out, attn = encoder_layer_forward(
        params, enc_input, adj, pine_heads=pine_heads, pine_hidden=pine_hidden,
        n_head=n_head, d_k=d_k, d_v=d_v)
    out, attn = jax.block_until_ready((out, attn))

    assert out.shape == (B, L, d_model)
    assert attn.shape == (B, n_head, L, L)
    assert bool(jnp.all(jnp.isfinite(out)))
    assert bool(jnp.all(jnp.isfinite(attn)))
    print("KERNEL_OK")
</pallas_src>

<mosaic_0001>
module attributes {stable_mosaic.version = 11 : i64} {
  func.func @_encoder_layer_kernel(%arg0: i32, %arg1: memref<1x7x32xf32, #tpu.memory_space<vmem>>, %arg2: memref<1x7x7xf32, #tpu.memory_space<vmem>>, %arg3: memref<32x64xf32, #tpu.memory_space<vmem>>, %arg4: memref<2x32xf32, #tpu.memory_space<vmem>>, %arg5: memref<32x2xf32, #tpu.memory_space<vmem>>, %arg6: memref<1x32xf32, #tpu.memory_space<vmem>>, %arg7: memref<32x64xf32, #tpu.memory_space<vmem>>, %arg8: memref<2x32xf32, #tpu.memory_space<vmem>>, %arg9: memref<32x2xf32, #tpu.memory_space<vmem>>, %arg10: memref<1x32xf32, #tpu.memory_space<vmem>>, %arg11: memref<32x96xf32, #tpu.memory_space<vmem>>, %arg12: memref<2x32xf32, #tpu.memory_space<vmem>>, %arg13: memref<32x2xf32, #tpu.memory_space<vmem>>, %arg14: memref<1x32xf32, #tpu.memory_space<vmem>>, %arg15: memref<32x96xf32, #tpu.memory_space<vmem>>, %arg16: memref<64x32xf32, #tpu.memory_space<vmem>>, %arg17: memref<1x32xf32, #tpu.memory_space<vmem>>, %arg18: memref<1x32xf32, #tpu.memory_space<vmem>>, %arg19: memref<32x64xf32, #tpu.memory_space<vmem>>, %arg20: memref<1x64xf32, #tpu.memory_space<vmem>>, %arg21: memref<64x32xf32, #tpu.memory_space<vmem>>, %arg22: memref<1x32xf32, #tpu.memory_space<vmem>>, %arg23: memref<1x32xf32, #tpu.memory_space<vmem>>, %arg24: memref<1x32xf32, #tpu.memory_space<vmem>>, %arg25: memref<1x7x32xf32, #tpu.memory_space<vmem>>, %arg26: memref<1x2x7x7xf32, #tpu.memory_space<vmem>>) attributes {dimension_semantics = [#tpu.dimension_semantics<parallel>], iteration_bounds = array<i64: 2>, scalar_prefetch = 0 : i64, scratch_operands = 0 : i64, tpu.core_type = #tpu.core_type<tc>, window_params = [{transform_indices = @transform_0, window_bounds = array<i64: 1, 7, 32>}, {transform_indices = @transform_1, window_bounds = array<i64: 1, 7, 7>}, {pipeline_mode = #tpu.pipeline_mode<synchronous>, transform_indices = @transform_2, window_bounds = array<i64: 32, 64>}, {pipeline_mode = #tpu.pipeline_mode<synchronous>, transform_indices = @transform_3, window_bounds = array<i64: 2, 32>}, {pipeline_mode = #tpu.pipeline_mode<synchronous>, transform_indices = @transform_4, window_bounds = array<i64: 32, 2>}, {pipeline_mode = #tpu.pipeline_mode<synchronous>, transform_indices = @transform_5, window_bounds = array<i64: 1, 32>}, {pipeline_mode = #tpu.pipeline_mode<synchronous>, transform_indices = @transform_6, window_bounds = array<i64: 32, 64>}, {pipeline_mode = #tpu.pipeline_mode<synchronous>, transform_indices = @transform_7, window_bounds = array<i64: 2, 32>}, {pipeline_mode = #tpu.pipeline_mode<synchronous>, transform_indices = @transform_8, window_bounds = array<i64: 32, 2>}, {pipeline_mode = #tpu.pipeline_mode<synchronous>, transform_indices = @transform_9, window_bounds = array<i64: 1, 32>}, {pipeline_mode = #tpu.pipeline_mode<synchronous>, transform_indices = @transform_10, window_bounds = array<i64: 32, 96>}, {pipeline_mode = #tpu.pipeline_mode<synchronous>, transform_indices = @transform_11, window_bounds = array<i64: 2, 32>}, {pipeline_mode = #tpu.pipeline_mode<synchronous>, transform_indices = @transform_12, window_bounds = array<i64: 32, 2>}, {pipeline_mode = #tpu.pipeline_mode<synchronous>, transform_indices = @transform_13, window_bounds = array<i64: 1, 32>}, {pipeline_mode = #tpu.pipeline_mode<synchronous>, transform_indices = @transform_14, window_bounds = array<i64: 32, 96>}, {pipeline_mode = #tpu.pipeline_mode<synchronous>, transform_indices = @transform_15, window_bounds = array<i64: 64, 32>}, {pipeline_mode = #tpu.pipeline_mode<synchronous>, transform_indices = @transform_16, window_bounds = array<i64: 1, 32>}, {pipeline_mode = #tpu.pipeline_mode<synchronous>, transform_indices = @transform_17, window_bounds = array<i64: 1, 32>}, {pipeline_mode = #tpu.pipeline_mode<synchronous>, transform_indices = @transform_18, window_bounds = array<i64: 32, 64>}, {pipeline_mode = #tpu.pipeline_mode<synchronous>, transform_indices = @transform_19, window_bounds = array<i64: 1, 64>}, {pipeline_mode = #tpu.pipeline_mode<synchronous>, transform_indices = @transform_20, window_bounds = array<i64: 64, 32>}, {pipeline_mode = #tpu.pipeline_mode<synchronous>, transform_indices = @transform_21, window_bounds = array<i64: 1, 32>}, {pipeline_mode = #tpu.pipeline_mode<synchronous>, transform_indices = @transform_22, window_bounds = array<i64: 1, 32>}, {pipeline_mode = #tpu.pipeline_mode<synchronous>, transform_indices = @transform_23, window_bounds = array<i64: 1, 32>}, {transform_indices = @transform_24, window_bounds = array<i64: 1, 7, 32>}, {transform_indices = @transform_25, window_bounds = array<i64: 1, 2, 7, 7>}]} {
    %c0 = arith.constant 0 : index
    %c0_0 = arith.constant 0 : index
    %c0_1 = arith.constant 0 : index
    %0 = vector.load %arg1[%c0, %c0_0, %c0_1] : memref<1x7x32xf32, #tpu.memory_space<vmem>>, vector<1x7x32xf32>
    %1 = vector.shape_cast %0 : vector<1x7x32xf32> to vector<7x32xf32>
    %c0_2 = arith.constant 0 : index
    %c0_3 = arith.constant 0 : index
    %c0_4 = arith.constant 0 : index
    %2 = vector.load %arg2[%c0_2, %c0_3, %c0_4] : memref<1x7x7xf32, #tpu.memory_space<vmem>>, vector<1x7x7xf32>
    %3 = vector.shape_cast %2 : vector<1x7x7xf32> to vector<7x7xf32>
    %cst = arith.constant 0.000000e+00 : f32
    %4 = vector.broadcast %cst : f32 to vector<7x7xf32>
    %5 = arith.cmpf ogt, %3, %4 : vector<7x7xf32>
    %c0_5 = arith.constant 0 : index
    %c0_6 = arith.constant 0 : index
    %6 = vector.load %arg3[%c0_5, %c0_6] : memref<32x64xf32, #tpu.memory_space<vmem>>, vector<32x64xf32>
    %cst_7 = arith.constant dense<0.000000e+00> : vector<7x64xf32>
    %7 = tpu.matmul %1, %6, %cst_7 {dimension_numbers = #tpu.dot_dimension_numbers<[1], [0], [0], [1], [0, 0, 1, 1], [], []>} : vector<7x32xf32>, vector<32x64xf32>, vector<7x64xf32> -> vector<7x64xf32>
    %8 = vector.extract_strided_slice %7 {offsets = [0, 0], sizes = [7, 32], strides = [1, 1]} : vector<7x64xf32> to vector<7x32xf32>
    %9 = vector.extract_strided_slice %7 {offsets = [0, 32], sizes = [7, 32], strides = [1, 1]} : vector<7x64xf32> to vector<7x32xf32>
    %c0_8 = arith.constant 0 : index
    %c0_9 = arith.constant 0 : index
    %10 = vector.load %arg5[%c0_8, %c0_9] : memref<32x2xf32, #tpu.memory_space<vmem>>, vector<32x2xf32>
    %cst_10 = arith.constant dense<0.000000e+00> : vector<7x2xf32>
    %11 = tpu.matmul %1, %10, %cst_10 {dimension_numbers = #tpu.dot_dimension_numbers<[1], [0], [0], [1], [0, 0, 1, 1], [], []>} : vector<7x32xf32>, vector<32x2xf32>, vector<7x2xf32> -> vector<7x2xf32>
    %12 = tpu.iota {dimensions = array<i32: 1>} : vector<1x2xi32>
    %13 = tpu.iota {dimensions = array<i32: 1>} : vector<1x32xi32>
    %c0_i32 = arith.constant 0 : i32
    %14 = vector.broadcast %c0_i32 : i32 to vector<1x2xi32>
    %15 = arith.cmpi eq, %12, %14 : vector<1x2xi32>
    %16 = arith.extui %15 : vector<1x2xi1> to vector<1x2xi32>
    %17 = arith.sitofp %16 : vector<1x2xi32> to vector<1x2xf32>
    %18 = vector.broadcast %17 : vector<1x2xf32> to vector<7x2xf32>
    %19 = arith.mulf %11, %18 : vector<7x2xf32>
    %cst_11 = arith.constant dense<0.000000e+00> : vector<7xf32>
    %20 = vector.multi_reduction <add>, %19, %cst_11 [1] : vector<7x2xf32> to vector<7xf32>
    %21 = vector.shape_cast %20 : vector<7xf32> to vector<7x1xf32>
    %c0_12 = arith.constant 0 : index
    %c0_13 = arith.constant 0 : index
    %22 = vector.load %arg4[%c0_12, %c0_13] : memref<2x32xf32, #tpu.memory_space<vmem>>, vector<1x32xf32>
    %cst_14 = arith.constant dense<0.000000e+00> : vector<1x7xf32>
    %23 = tpu.matmul %22, %1, %cst_14 {dimension_numbers = #tpu.dot_dimension_numbers<[1], [1], [0], [0], [0, 0, 1, 0], [], []>} : vector<1x32xf32>, vector<7x32xf32>, vector<1x7xf32> -> vector<1x7xf32>
    %24 = vector.broadcast %21 : vector<7x1xf32> to vector<7x7xf32>
    %25 = vector.broadcast %23 : vector<1x7xf32> to vector<7x7xf32>
    %26 = arith.addf %24, %25 : vector<7x7xf32>
    %cst_15 = arith.constant 0.000000e+00 : f32
    %27 = vector.broadcast %cst_15 : f32 to vector<7x7xf32>
    %28 = arith.cmpf ogt, %26, %27 : vector<7x7xf32>
    %cst_16 = arith.constant 2.000000e-01 : f32
    %29 = vector.broadcast %cst_16 : f32 to vector<7x7xf32>
    %30 = arith.mulf %29, %26 : vector<7x7xf32>
    %31 = arith.select %28, %26, %30 : vector<7x7xi1>, vector<7x7xf32>
    %cst_17 = arith.constant -1.000000e+30 : f32
    %32 = vector.broadcast %cst_17 : f32 to vector<7x7xf32>
    %33 = arith.select %5, %31, %32 : vector<7x7xi1>, vector<7x7xf32>
    %cst_18 = arith.constant dense<0xFF800000> : vector<7xf32>
    %34 = vector.multi_reduction <maximumf>, %33, %cst_18 [1] : vector<7x7xf32> to vector<7xf32>
    %35 = vector.shape_cast %34 : vector<7xf32> to vector<7x1xf32>
    %36 = vector.broadcast %35 : vector<7x1xf32> to vector<7x7xf32>
    %37 = arith.subf %33, %36 : vector<7x7xf32>
    %38 = math.exp %37 : vector<7x7xf32>
    %cst_19 = arith.constant dense<0.000000e+00> : vector<7xf32>
    %39 = vector.multi_reduction <add>, %38, %cst_19 [1] : vector<7x7xf32> to vector<7xf32>
    %40 = vector.shape_cast %39 : vector<7xf32> to vector<7x1xf32>
    %41 = tpu.reciprocal %40 {approx = true} : vector<7x1xf32> -> vector<7x1xf32>
    %42 = vector.broadcast %41 : vector<7x1xf32> to vector<7x7xf32>
    %43 = arith.mulf %38, %42 : vector<7x7xf32>
    %cst_20 = arith.constant dense<0.000000e+00> : vector<7x32xf32>
    %44 = tpu.matmul %43, %8, %cst_20 {dimension_numbers = #tpu.dot_dimension_numbers<[1], [0], [0], [1], [0, 0, 1, 1], [], []>} : vector<7x7xf32>, vector<7x32xf32>, vector<7x32xf32> -> vector<7x32xf32>
    %c0_i32_21 = arith.constant 0 : i32
    %45 = vector.broadcast %c0_i32_21 : i32 to vector<1x32xi32>
    %46 = arith.cmpi sge, %13, %45 : vector<1x32xi32>
    %c16_i32 = arith.constant 16 : i32
    %47 = vector.broadcast %c16_i32 : i32 to vector<1x32xi32>
    %48 = arith.cmpi slt, %13, %47 : vector<1x32xi32>
    %49 = arith.andi %46, %48 : vector<1x32xi1>
    %50 = arith.extui %49 : vector<1x32xi1> to vector<1x32xi32>
    %51 = arith.sitofp %50 : vector<1x32xi32> to vector<1x32xf32>
    %52 = vector.broadcast %51 : vector<1x32xf32> to vector<7x32xf32>
    %53 = arith.mulf %44, %52 : vector<7x32xf32>
    %c1_i32 = arith.constant 1 : i32
    %54 = vector.broadcast %c1_i32 : i32 to vector<1x2xi32>
    %55 = arith.cmpi eq, %12, %54 : vector<1x2xi32>
    %56 = arith.extui %55 : vector<1x2xi1> to vector<1x2xi32>
    %57 = arith.sitofp %56 : vector<1x2xi32> to vector<1x2xf32>
    %58 = vector.broadcast %57 : vector<1x2xf32> to vector<7x2xf32>
    %59 = arith.mulf %11, %58 : vector<7x2xf32>
    %cst_22 = arith.constant dense<0.000000e+00> : vector<7xf32>
    %60 = vector.multi_reduction <add>, %59, %cst_22 [1] : vector<7x2xf32> to vector<7xf32>
    %61 = vector.shape_cast %60 : vector<7xf32> to vector<7x1xf32>
    %c1 = arith.constant 1 : index
    %c0_23 = arith.constant 0 : index
    %62 = vector.load %arg4[%c1, %c0_23] : memref<2x32xf32, #tpu.memory_space<vmem>>, vector<1x32xf32>
    %cst_24 = arith.constant dense<0.000000e+00> : vector<1x7xf32>
    %63 = tpu.matmul %62, %1, %cst_24 {dimension_numbers = #tpu.dot_dimension_numbers<[1], [1], [0], [0], [0, 0, 1, 0], [], []>} : vector<1x32xf32>, vector<7x32xf32>, vector<1x7xf32> -> vector<1x7xf32>
    %64 = vector.broadcast %61 : vector<7x1xf32> to vector<7x7xf32>
    %65 = vector.broadcast %63 : vector<1x7xf32> to vector<7x7xf32>
    %66 = arith.addf %64, %65 : vector<7x7xf32>
    %cst_25 = arith.constant 0.000000e+00 : f32
    %67 = vector.broadcast %cst_25 : f32 to vector<7x7xf32>
    %68 = arith.cmpf ogt, %66, %67 : vector<7x7xf32>
    %cst_26 = arith.constant 2.000000e-01 : f32
    %69 = vector.broadcast %cst_26 : f32 to vector<7x7xf32>
    %70 = arith.mulf %69, %66 : vector<7x7xf32>
    %71 = arith.select %68, %66, %70 : vector<7x7xi1>, vector<7x7xf32>
    %cst_27 = arith.constant -1.000000e+30 : f32
    %72 = vector.broadcast %cst_27 : f32 to vector<7x7xf32>
    %73 = arith.select %5, %71, %72 : vector<7x7xi1>, vector<7x7xf32>
    %cst_28 = arith.constant dense<0xFF800000> : vector<7xf32>
    %74 = vector.multi_reduction <maximumf>, %73, %cst_28 [1] : vector<7x7xf32> to vector<7xf32>
    %75 = vector.shape_cast %74 : vector<7xf32> to vector<7x1xf32>
    %76 = vector.broadcast %75 : vector<7x1xf32> to vector<7x7xf32>
    %77 = arith.subf %73, %76 : vector<7x7xf32>
    %78 = math.exp %77 : vector<7x7xf32>
    %cst_29 = arith.constant dense<0.000000e+00> : vector<7xf32>
    %79 = vector.multi_reduction <add>, %78, %cst_29 [1] : vector<7x7xf32> to vector<7xf32>
    %80 = vector.shape_cast %79 : vector<7xf32> to vector<7x1xf32>
    %81 = tpu.reciprocal %80 {approx = true} : vector<7x1xf32> -> vector<7x1xf32>
    %82 = vector.broadcast %81 : vector<7x1xf32> to vector<7x7xf32>
    %83 = arith.mulf %78, %82 : vector<7x7xf32>
    %cst_30 = arith.constant dense<0.000000e+00> : vector<7x32xf32>
    %84 = tpu.matmul %83, %8, %cst_30 {dimension_numbers = #tpu.dot_dimension_numbers<[1], [0], [0], [1], [0, 0, 1, 1], [], []>} : vector<7x7xf32>, vector<7x32xf32>, vector<7x32xf32> -> vector<7x32xf32>
    %c16_i32_31 = arith.constant 16 : i32
    %85 = vector.broadcast %c16_i32_31 : i32 to vector<1x32xi32>
    %86 = arith.cmpi sge, %13, %85 : vector<1x32xi32>
    %c32_i32 = arith.constant 32 : i32
    %87 = vector.broadcast %c32_i32 : i32 to vector<1x32xi32>
    %88 = arith.cmpi slt, %13, %87 : vector<1x32xi32>
    %89 = arith.andi %86, %88 : vector<1x32xi1>
    %90 = arith.extui %89 : vector<1x32xi1> to vector<1x32xi32>
    %91 = arith.sitofp %90 : vector<1x32xi32> to vector<1x32xf32>
    %92 = vector.broadcast %91 : vector<1x32xf32> to vector<7x32xf32>
    %93 = arith.mulf %84, %92 : vector<7x32xf32>
    %94 = arith.addf %53, %93 : vector<7x32xf32>
    %95 = arith.addf %94, %9 : vector<7x32xf32>
    %c0_32 = arith.constant 0 : index
    %c0_33 = arith.constant 0 : index
    %96 = vector.load %arg6[%c0_32, %c0_33] : memref<1x32xf32, #tpu.memory_space<vmem>>, vector<1x32xf32>
    %97 = vector.broadcast %96 : vector<1x32xf32> to vector<7x32xf32>
    %98 = arith.addf %95, %97 : vector<7x32xf32>
    %cst_34 = arith.constant 0.000000e+00 : f32
    %99 = vector.broadcast %cst_34 : f32 to vector<7x32xf32>
    %100 = arith.cmpf ogt, %98, %99 : vector<7x32xf32>
    %cst_35 = arith.constant 0.000000e+00 : f32
    %101 = vector.broadcast %cst_35 : f32 to vector<7x32xf32>
    %102 = arith.minimumf %98, %101 : vector<7x32xf32>
    %103 = math.exp %102 : vector<7x32xf32>
    %cst_36 = arith.constant 1.000000e+00 : f32
    %104 = vector.broadcast %cst_36 : f32 to vector<7x32xf32>
    %105 = arith.subf %103, %104 : vector<7x32xf32>
    %106 = arith.select %100, %98, %105 : vector<7x32xi1>, vector<7x32xf32>
    %c0_37 = arith.constant 0 : index
    %c0_38 = arith.constant 0 : index
    %107 = vector.load %arg7[%c0_37, %c0_38] : memref<32x64xf32, #tpu.memory_space<vmem>>, vector<32x64xf32>
    %cst_39 = arith.constant dense<0.000000e+00> : vector<7x64xf32>
    %108 = tpu.matmul %106, %107, %cst_39 {dimension_numbers = #tpu.dot_dimension_numbers<[1], [0], [0], [1], [0, 0, 1, 1], [], []>} : vector<7x32xf32>, vector<32x64xf32>, vector<7x64xf32> -> vector<7x64xf32>
    %109 = vector.extract_strided_slice %108 {offsets = [0, 0], sizes = [7, 32], strides = [1, 1]} : vector<7x64xf32> to vector<7x32xf32>
    %110 = vector.extract_strided_slice %108 {offsets = [0, 32], sizes = [7, 32], strides = [1, 1]} : vector<7x64xf32> to vector<7x32xf32>
    %c0_40 = arith.constant 0 : index
    %c0_41 = arith.constant 0 : index
    %111 = vector.load %arg9[%c0_40, %c0_41] : memref<32x2xf32, #tpu.memory_space<vmem>>, vector<32x2xf32>
    %cst_42 = arith.constant dense<0.000000e+00> : vector<7x2xf32>
    %112 = tpu.matmul %106, %111, %cst_42 {dimension_numbers = #tpu.dot_dimension_numbers<[1], [0], [0], [1], [0, 0, 1, 1], [], []>} : vector<7x32xf32>, vector<32x2xf32>, vector<7x2xf32> -> vector<7x2xf32>
    %113 = tpu.iota {dimensions = array<i32: 1>} : vector<1x2xi32>
    %114 = tpu.iota {dimensions = array<i32: 1>} : vector<1x32xi32>
    %c0_i32_43 = arith.constant 0 : i32
    %115 = vector.broadcast %c0_i32_43 : i32 to vector<1x2xi32>
    %116 = arith.cmpi eq, %113, %115 : vector<1x2xi32>
    %117 = arith.extui %116 : vector<1x2xi1> to vector<1x2xi32>
    %118 = arith.sitofp %117 : vector<1x2xi32> to vector<1x2xf32>
    %119 = vector.broadcast %118 : vector<1x2xf32> to vector<7x2xf32>
    %120 = arith.mulf %112, %119 : vector<7x2xf32>
    %cst_44 = arith.constant dense<0.000000e+00> : vector<7xf32>
    %121 = vector.multi_reduction <add>, %120, %cst_44 [1] : vector<7x2xf32> to vector<7xf32>
    %122 = vector.shape_cast %121 : vector<7xf32> to vector<7x1xf32>
    %c0_45 = arith.constant 0 : index
    %c0_46 = arith.constant 0 : index
    %123 = vector.load %arg8[%c0_45, %c0_46] : memref<2x32xf32, #tpu.memory_space<vmem>>, vector<1x32xf32>
    %cst_47 = arith.constant dense<0.000000e+00> : vector<1x7xf32>
    %124 = tpu.matmul %123, %106, %cst_47 {dimension_numbers = #tpu.dot_dimension_numbers<[1], [1], [0], [0], [0, 0, 1, 0], [], []>} : vector<1x32xf32>, vector<7x32xf32>, vector<1x7xf32> -> vector<1x7xf32>
    %125 = vector.broadcast %122 : vector<7x1xf32> to vector<7x7xf32>
    %126 = vector.broadcast %124 : vector<1x7xf32> to vector<7x7xf32>
    %127 = arith.addf %125, %126 : vector<7x7xf32>
    %cst_48 = arith.constant 0.000000e+00 : f32
    %128 = vector.broadcast %cst_48 : f32 to vector<7x7xf32>
    %129 = arith.cmpf ogt, %127, %128 : vector<7x7xf32>
    %cst_49 = arith.constant 2.000000e-01 : f32
    %130 = vector.broadcast %cst_49 : f32 to vector<7x7xf32>
    %131 = arith.mulf %130, %127 : vector<7x7xf32>
    %132 = arith.select %129, %127, %131 : vector<7x7xi1>, vector<7x7xf32>
    %cst_50 = arith.constant -1.000000e+30 : f32
    %133 = vector.broadcast %cst_50 : f32 to vector<7x7xf32>
    %134 = arith.select %5, %132, %133 : vector<7x7xi1>, vector<7x7xf32>
    %cst_51 = arith.constant dense<0xFF800000> : vector<7xf32>
    %135 = vector.multi_reduction <maximumf>, %134, %cst_51 [1] : vector<7x7xf32> to vector<7xf32>
    %136 = vector.shape_cast %135 : vector<7xf32> to vector<7x1xf32>
    %137 = vector.broadcast %136 : vector<7x1xf32> to vector<7x7xf32>
    %138 = arith.subf %134, %137 : vector<7x7xf32>
    %139 = math.exp %138 : vector<7x7xf32>
    %cst_52 = arith.constant dense<0.000000e+00> : vector<7xf32>
    %140 = vector.multi_reduction <add>, %139, %cst_52 [1] : vector<7x7xf32> to vector<7xf32>
    %141 = vector.shape_cast %140 : vector<7xf32> to vector<7x1xf32>
    %142 = tpu.reciprocal %141 {approx = true} : vector<7x1xf32> -> vector<7x1xf32>
    %143 = vector.broadcast %142 : vector<7x1xf32> to vector<7x7xf32>
    %144 = arith.mulf %139, %143 : vector<7x7xf32>
    %cst_53 = arith.constant dense<0.000000e+00> : vector<7x32xf32>
    %145 = tpu.matmul %144, %109, %cst_53 {dimension_numbers = #tpu.dot_dimension_numbers<[1], [0], [0], [1], [0, 0, 1, 1], [], []>} : vector<7x7xf32>, vector<7x32xf32>, vector<7x32xf32> -> vector<7x32xf32>
    %c0_i32_54 = arith.constant 0 : i32
    %146 = vector.broadcast %c0_i32_54 : i32 to vector<1x32xi32>
    %147 = arith.cmpi sge, %114, %146 : vector<1x32xi32>
    %c16_i32_55 = arith.constant 16 : i32
    %148 = vector.broadcast %c16_i32_55 : i32 to vector<1x32xi32>
    %149 = arith.cmpi slt, %114, %148 : vector<1x32xi32>
    %150 = arith.andi %147, %149 : vector<1x32xi1>
    %151 = arith.extui %150 : vector<1x32xi1> to vector<1x32xi32>
    %152 = arith.sitofp %151 : vector<1x32xi32> to vector<1x32xf32>
    %153 = vector.broadcast %152 : vector<1x32xf32> to vector<7x32xf32>
    %154 = arith.mulf %145, %153 : vector<7x32xf32>
    %c1_i32_56 = arith.constant 1 : i32
    %155 = vector.broadcast %c1_i32_56 : i32 to vector<1x2xi32>
    %156 = arith.cmpi eq, %113, %155 : vector<1x2xi32>
    %157 = arith.extui %156 : vector<1x2xi1> to vector<1x2xi32>
    %158 = arith.sitofp %157 : vector<1x2xi32> to vector<1x2xf32>
    %159 = vector.broadcast %158 : vector<1x2xf32> to vector<7x2xf32>
    %160 = arith.mulf %112, %159 : vector<7x2xf32>
    %cst_57 = arith.constant dense<0.000000e+00> : vector<7xf32>
    %161 = vector.multi_reduction <add>, %160, %cst_57 [1] : vector<7x2xf32> to vector<7xf32>
    %162 = vector.shape_cast %161 : vector<7xf32> to vector<7x1xf32>
    %c1_58 = arith.constant 1 : index
    %c0_59 = arith.constant 0 : index
    %163 = vector.load %arg8[%c1_58, %c0_59] : memref<2x32xf32, #tpu.memory_space<vmem>>, vector<1x32xf32>
    %cst_60 = arith.constant dense<0.000000e+00> : vector<1x7xf32>
    %164 = tpu.matmul %163, %106, %cst_60 {dimension_numbers = #tpu.dot_dimension_numbers<[1], [1], [0], [0], [0, 0, 1, 0], [], []>} : vector<1x32xf32>, vector<7x32xf32>, vector<1x7xf32> -> vector<1x7xf32>
    %165 = vector.broadcast %162 : vector<7x1xf32> to vector<7x7xf32>
    %166 = vector.broadcast %164 : vector<1x7xf32> to vector<7x7xf32>
    %167 = arith.addf %165, %166 : vector<7x7xf32>
    %cst_61 = arith.constant 0.000000e+00 : f32
    %168 = vector.broadcast %cst_61 : f32 to vector<7x7xf32>
    %169 = arith.cmpf ogt, %167, %168 : vector<7x7xf32>
    %cst_62 = arith.constant 2.000000e-01 : f32
    %170 = vector.broadcast %cst_62 : f32 to vector<7x7xf32>
    %171 = arith.mulf %170, %167 : vector<7x7xf32>
    %172 = arith.select %169, %167, %171 : vector<7x7xi1>, vector<7x7xf32>
    %cst_63 = arith.constant -1.000000e+30 : f32
    %173 = vector.broadcast %cst_63 : f32 to vector<7x7xf32>
    %174 = arith.select %5, %172, %173 : vector<7x7xi1>, vector<7x7xf32>
    %cst_64 = arith.constant dense<0xFF800000> : vector<7xf32>
    %175 = vector.multi_reduction <maximumf>, %174, %cst_64 [1] : vector<7x7xf32> to vector<7xf32>
    %176 = vector.shape_cast %175 : vector<7xf32> to vector<7x1xf32>
    %177 = vector.broadcast %176 : vector<7x1xf32> to vector<7x7xf32>
    %178 = arith.subf %174, %177 : vector<7x7xf32>
    %179 = math.exp %178 : vector<7x7xf32>
    %cst_65 = arith.constant dense<0.000000e+00> : vector<7xf32>
    %180 = vector.multi_reduction <add>, %179, %cst_65 [1] : vector<7x7xf32> to vector<7xf32>
    %181 = vector.shape_cast %180 : vector<7xf32> to vector<7x1xf32>
    %182 = tpu.reciprocal %181 {approx = true} : vector<7x1xf32> -> vector<7x1xf32>
    %183 = vector.broadcast %182 : vector<7x1xf32> to vector<7x7xf32>
    %184 = arith.mulf %179, %183 : vector<7x7xf32>
    %cst_66 = arith.constant dense<0.000000e+00> : vector<7x32xf32>
    %185 = tpu.matmul %184, %109, %cst_66 {dimension_numbers = #tpu.dot_dimension_numbers<[1], [0], [0], [1], [0, 0, 1, 1], [], []>} : vector<7x7xf32>, vector<7x32xf32>, vector<7x32xf32> -> vector<7x32xf32>
    %c16_i32_67 = arith.constant 16 : i32
    %186 = vector.broadcast %c16_i32_67 : i32 to vector<1x32xi32>
    %187 = arith.cmpi sge, %114, %186 : vector<1x32xi32>
    %c32_i32_68 = arith.constant 32 : i32
    %188 = vector.broadcast %c32_i32_68 : i32 to vector<1x32xi32>
    %189 = arith.cmpi slt, %114, %188 : vector<1x32xi32>
    %190 = arith.andi %187, %189 : vector<1x32xi1>
    %191 = arith.extui %190 : vector<1x32xi1> to vector<1x32xi32>
    %192 = arith.sitofp %191 : vector<1x32xi32> to vector<1x32xf32>
    %193 = vector.broadcast %192 : vector<1x32xf32> to vector<7x32xf32>
    %194 = arith.mulf %185, %193 : vector<7x32xf32>
    %195 = arith.addf %154, %194 : vector<7x32xf32>
    %196 = arith.addf %195, %110 : vector<7x32xf32>
    %c0_69 = arith.constant 0 : index
    %c0_70 = arith.constant 0 : index
    %197 = vector.load %arg10[%c0_69, %c0_70] : memref<1x32xf32, #tpu.memory_space<vmem>>, vector<1x32xf32>
    %198 = vector.broadcast %197 : vector<1x32xf32> to vector<7x32xf32>
    %199 = arith.addf %196, %198 : vector<7x32xf32>
    %cst_71 = arith.constant 0.000000e+00 : f32
    %200 = vector.broadcast %cst_71 : f32 to vector<7x32xf32>
    %201 = arith.cmpf ogt, %199, %200 : vector<7x32xf32>
    %cst_72 = arith.constant 0.000000e+00 : f32
    %202 = vector.broadcast %cst_72 : f32 to vector<7x32xf32>
    %203 = arith.minimumf %199, %202 : vector<7x32xf32>
    %204 = math.exp %203 : vector<7x32xf32>
    %cst_73 = arith.constant 1.000000e+00 : f32
    %205 = vector.broadcast %cst_73 : f32 to vector<7x32xf32>
    %206 = arith.subf %204, %205 : vector<7x32xf32>
    %207 = arith.select %201, %199, %206 : vector<7x32xi1>, vector<7x32xf32>
    %c0_74 = arith.constant 0 : index
    %c0_75 = arith.constant 0 : index
    %208 = vector.load %arg11[%c0_74, %c0_75] : memref<32x96xf32, #tpu.memory_space<vmem>>, vector<32x96xf32>
    %cst_76 = arith.constant dense<0.000000e+00> : vector<7x96xf32>
    %209 = tpu.matmul %207, %208, %cst_76 {dimension_numbers = #tpu.dot_dimension_numbers<[1], [0], [0], [1], [0, 0, 1, 1], [], []>} : vector<7x32xf32>, vector<32x96xf32>, vector<7x96xf32> -> vector<7x96xf32>
    %210 = vector.extract_strided_slice %209 {offsets = [0, 0], sizes = [7, 64], strides = [1, 1]} : vector<7x96xf32> to vector<7x64xf32>
    %211 = vector.extract_strided_slice %209 {offsets = [0, 64], sizes = [7, 32], strides = [1, 1]} : vector<7x96xf32> to vector<7x32xf32>
    %c0_77 = arith.constant 0 : index
    %c0_78 = arith.constant 0 : index
    %212 = vector.load %arg13[%c0_77, %c0_78] : memref<32x2xf32, #tpu.memory_space<vmem>>, vector<32x2xf32>
    %cst_79 = arith.constant dense<0.000000e+00> : vector<7x2xf32>
    %213 = tpu.matmul %207, %212, %cst_79 {dimension_numbers = #tpu.dot_dimension_numbers<[1], [0], [0], [1], [0, 0, 1, 1], [], []>} : vector<7x32xf32>, vector<32x2xf32>, vector<7x2xf32> -> vector<7x2xf32>
    %214 = tpu.iota {dimensions = array<i32: 1>} : vector<1x2xi32>
    %c0_i32_80 = arith.constant 0 : i32
    %215 = vector.broadcast %c0_i32_80 : i32 to vector<1x2xi32>
    %216 = arith.cmpi eq, %214, %215 : vector<1x2xi32>
    %217 = arith.extui %216 : vector<1x2xi1> to vector<1x2xi32>
    %218 = arith.sitofp %217 : vector<1x2xi32> to vector<1x2xf32>
    %219 = vector.broadcast %218 : vector<1x2xf32> to vector<7x2xf32>
    %220 = arith.mulf %213, %219 : vector<7x2xf32>
    %cst_81 = arith.constant dense<0.000000e+00> : vector<7xf32>
    %221 = vector.multi_reduction <add>, %220, %cst_81 [1] : vector<7x2xf32> to vector<7xf32>
    %222 = vector.shape_cast %221 : vector<7xf32> to vector<7x1xf32>
    %c0_82 = arith.constant 0 : index
    %c0_83 = arith.constant 0 : index
    %223 = vector.load %arg12[%c0_82, %c0_83] : memref<2x32xf32, #tpu.memory_space<vmem>>, vector<1x32xf32>
    %cst_84 = arith.constant dense<0.000000e+00> : vector<1x7xf32>
    %224 = tpu.matmul %223, %207, %cst_84 {dimension_numbers = #tpu.dot_dimension_numbers<[1], [1], [0], [0], [0, 0, 1, 0], [], []>} : vector<1x32xf32>, vector<7x32xf32>, vector<1x7xf32> -> vector<1x7xf32>
    %225 = vector.broadcast %222 : vector<7x1xf32> to vector<7x7xf32>
    %226 = vector.broadcast %224 : vector<1x7xf32> to vector<7x7xf32>
    %227 = arith.addf %225, %226 : vector<7x7xf32>
    %cst_85 = arith.constant 0.000000e+00 : f32
    %228 = vector.broadcast %cst_85 : f32 to vector<7x7xf32>
    %229 = arith.cmpf ogt, %227, %228 : vector<7x7xf32>
    %cst_86 = arith.constant 2.000000e-01 : f32
    %230 = vector.broadcast %cst_86 : f32 to vector<7x7xf32>
    %231 = arith.mulf %230, %227 : vector<7x7xf32>
    %232 = arith.select %229, %227, %231 : vector<7x7xi1>, vector<7x7xf32>
    %cst_87 = arith.constant -1.000000e+30 : f32
    %233 = vector.broadcast %cst_87 : f32 to vector<7x7xf32>
    %234 = arith.select %5, %232, %233 : vector<7x7xi1>, vector<7x7xf32>
    %cst_88 = arith.constant dense<0xFF800000> : vector<7xf32>
    %235 = vector.multi_reduction <maximumf>, %234, %cst_88 [1] : vector<7x7xf32> to vector<7xf32>
    %236 = vector.shape_cast %235 : vector<7xf32> to vector<7x1xf32>
    %237 = vector.broadcast %236 : vector<7x1xf32> to vector<7x7xf32>
    %238 = arith.subf %234, %237 : vector<7x7xf32>
    %239 = math.exp %238 : vector<7x7xf32>
    %cst_89 = arith.constant dense<0.000000e+00> : vector<7xf32>
    %240 = vector.multi_reduction <add>, %239, %cst_89 [1] : vector<7x7xf32> to vector<7xf32>
    %241 = vector.shape_cast %240 : vector<7xf32> to vector<7x1xf32>
    %242 = tpu.reciprocal %241 {approx = true} : vector<7x1xf32> -> vector<7x1xf32>
    %243 = vector.broadcast %242 : vector<7x1xf32> to vector<7x7xf32>
    %244 = arith.mulf %239, %243 : vector<7x7xf32>
    %245 = vector.extract_strided_slice %210 {offsets = [0, 0], sizes = [7, 32], strides = [1, 1]} : vector<7x64xf32> to vector<7x32xf32>
    %cst_90 = arith.constant dense<0.000000e+00> : vector<7x32xf32>
    %246 = tpu.matmul %244, %245, %cst_90 {dimension_numbers = #tpu.dot_dimension_numbers<[1], [0], [0], [1], [0, 0, 1, 1], [], []>} : vector<7x7xf32>, vector<7x32xf32>, vector<7x32xf32> -> vector<7x32xf32>
    %c1_i32_91 = arith.constant 1 : i32
    %247 = vector.broadcast %c1_i32_91 : i32 to vector<1x2xi32>
    %248 = arith.cmpi eq, %214, %247 : vector<1x2xi32>
    %249 = arith.extui %248 : vector<1x2xi1> to vector<1x2xi32>
    %250 = arith.sitofp %249 : vector<1x2xi32> to vector<1x2xf32>
    %251 = vector.broadcast %250 : vector<1x2xf32> to vector<7x2xf32>
    %252 = arith.mulf %213, %251 : vector<7x2xf32>
    %cst_92 = arith.constant dense<0.000000e+00> : vector<7xf32>
    %253 = vector.multi_reduction <add>, %252, %cst_92 [1] : vector<7x2xf32> to vector<7xf32>
    %254 = vector.shape_cast %253 : vector<7xf32> to vector<7x1xf32>
    %c1_93 = arith.constant 1 : index
    %c0_94 = arith.constant 0 : index
    %255 = vector.load %arg12[%c1_93, %c0_94] : memref<2x32xf32, #tpu.memory_space<vmem>>, vector<1x32xf32>
    %cst_95 = arith.constant dense<0.000000e+00> : vector<1x7xf32>
    %256 = tpu.matmul %255, %207, %cst_95 {dimension_numbers = #tpu.dot_dimension_numbers<[1], [1], [0], [0], [0, 0, 1, 0], [], []>} : vector<1x32xf32>, vector<7x32xf32>, vector<1x7xf32> -> vector<1x7xf32>
    %257 = vector.broadcast %254 : vector<7x1xf32> to vector<7x7xf32>
    %258 = vector.broadcast %256 : vector<1x7xf32> to vector<7x7xf32>
    %259 = arith.addf %257, %258 : vector<7x7xf32>
    %cst_96 = arith.constant 0.000000e+00 : f32
    %260 = vector.broadcast %cst_96 : f32 to vector<7x7xf32>
    %261 = arith.cmpf ogt, %259, %260 : vector<7x7xf32>
    %cst_97 = arith.constant 2.000000e-01 : f32
    %262 = vector.broadcast %cst_97 : f32 to vector<7x7xf32>
    %263 = arith.mulf %262, %259 : vector<7x7xf32>
    %264 = arith.select %261, %259, %263 : vector<7x7xi1>, vector<7x7xf32>
    %cst_98 = arith.constant -1.000000e+30 : f32
    %265 = vector.broadcast %cst_98 : f32 to vector<7x7xf32>
    %266 = arith.select %5, %264, %265 : vector<7x7xi1>, vector<7x7xf32>
    %cst_99 = arith.constant dense<0xFF800000> : vector<7xf32>
    %267 = vector.multi_reduction <maximumf>, %266, %cst_99 [1] : vector<7x7xf32> to vector<7xf32>
    %268 = vector.shape_cast %267 : vector<7xf32> to vector<7x1xf32>
    %269 = vector.broadcast %268 : vector<7x1xf32> to vector<7x7xf32>
    %270 = arith.subf %266, %269 : vector<7x7xf32>
    %271 = math.exp %270 : vector<7x7xf32>
    %cst_100 = arith.constant dense<0.000000e+00> : vector<7xf32>
    %272 = vector.multi_reduction <add>, %271, %cst_100 [1] : vector<7x7xf32> to vector<7xf32>
    %273 = vector.shape_cast %272 : vector<7xf32> to vector<7x1xf32>
    %274 = tpu.reciprocal %273 {approx = true} : vector<7x1xf32> -> vector<7x1xf32>
    %275 = vector.broadcast %274 : vector<7x1xf32> to vector<7x7xf32>
    %276 = arith.mulf %271, %275 : vector<7x7xf32>
    %277 = vector.extract_strided_slice %210 {offsets = [0, 32], sizes = [7, 32], strides = [1, 1]} : vector<7x64xf32> to vector<7x32xf32>
    %cst_101 = arith.constant dense<0.000000e+00> : vector<7x32xf32>
    %278 = tpu.matmul %276, %277, %cst_101 {dimension_numbers = #tpu.dot_dimension_numbers<[1], [0], [0], [1], [0, 0, 1, 1], [], []>} : vector<7x7xf32>, vector<7x32xf32>, vector<7x32xf32> -> vector<7x32xf32>
    %279 = arith.addf %246, %278 : vector<7x32xf32>
    %cst_102 = arith.constant 5.000000e-01 : f32
    %280 = vector.broadcast %cst_102 : f32 to vector<7x32xf32>
    %281 = arith.mulf %279, %280 : vector<7x32xf32>
    %282 = arith.addf %281, %211 : vector<7x32xf32>
    %c0_103 = arith.constant 0 : index
    %c0_104 = arith.constant 0 : index
    %283 = vector.load %arg14[%c0_103, %c0_104] : memref<1x32xf32, #tpu.memory_space<vmem>>, vector<1x32xf32>
    %284 = vector.broadcast %283 : vector<1x32xf32> to vector<7x32xf32>
    %285 = arith.addf %282, %284 : vector<7x32xf32>
    %c0_105 = arith.constant 0 : index
    %c0_106 = arith.constant 0 : index
    %286 = vector.load %arg15[%c0_105, %c0_106] : memref<32x96xf32, #tpu.memory_space<vmem>>, vector<32x96xf32>
    %cst_107 = arith.constant dense<0.000000e+00> : vector<7x96xf32>
    %287 = tpu.matmul %1, %286, %cst_107 {dimension_numbers = #tpu.dot_dimension_numbers<[1], [0], [0], [1], [0, 0, 1, 1], [], []>} : vector<7x32xf32>, vector<32x96xf32>, vector<7x96xf32> -> vector<7x96xf32>
    %c0_108 = arith.constant 0 : index
    %c0_109 = arith.constant 0 : index
    %288 = vector.load %arg16[%c0_108, %c0_109] : memref<64x32xf32, #tpu.memory_space<vmem>>, vector<64x32xf32>
    %289 = vector.extract_strided_slice %288 {offsets = [0, 0], sizes = [32, 32], strides = [1, 1]} : vector<64x32xf32> to vector<32x32xf32>
    %cst_110 = arith.constant dense<0.000000e+00> : vector<7x32xf32>
    %290 = tpu.matmul %285, %289, %cst_110 {dimension_numbers = #tpu.dot_dimension_numbers<[1], [0], [0], [1], [0, 0, 1, 1], [], []>} : vector<7x32xf32>, vector<32x32xf32>, vector<7x32xf32> -> vector<7x32xf32>
    %291 = arith.addf %290, %1 : vector<7x32xf32>
    %292 = vector.extract_strided_slice %287 {offsets = [0, 0], sizes = [7, 16], strides = [1, 1]} : vector<7x96xf32> to vector<7x16xf32>
    %cst_111 = arith.constant 2.500000e-01 : f32
    %293 = vector.broadcast %cst_111 : f32 to vector<7x16xf32>
    %294 = arith.mulf %292, %293 : vector<7x16xf32>
    %295 = vector.extract_strided_slice %287 {offsets = [0, 32], sizes = [7, 16], strides = [1, 1]} : vector<7x96xf32> to vector<7x16xf32>
    %296 = vector.extract_strided_slice %287 {offsets = [0, 64], sizes = [7, 16], strides = [1, 1]} : vector<7x96xf32> to vector<7x16xf32>
    %cst_112 = arith.constant dense<0.000000e+00> : vector<7x7xf32>
    %297 = tpu.matmul %294, %295, %cst_112 {dimension_numbers = #tpu.dot_dimension_numbers<[1], [1], [0], [0], [0, 0, 1, 0], [], []>} : vector<7x16xf32>, vector<7x16xf32>, vector<7x7xf32> -> vector<7x7xf32>
    %cst_113 = arith.constant dense<0xFF800000> : vector<7xf32>
    %298 = vector.multi_reduction <maximumf>, %297, %cst_113 [1] : vector<7x7xf32> to vector<7xf32>
    %299 = vector.shape_cast %298 : vector<7xf32> to vector<7x1xf32>
    %300 = vector.broadcast %299 : vector<7x1xf32> to vector<7x7xf32>
    %301 = arith.subf %297, %300 : vector<7x7xf32>
    %302 = math.exp %301 : vector<7x7xf32>
    %cst_114 = arith.constant dense<0.000000e+00> : vector<7xf32>
    %303 = vector.multi_reduction <add>, %302, %cst_114 [1] : vector<7x7xf32> to vector<7xf32>
    %304 = vector.shape_cast %303 : vector<7xf32> to vector<7x1xf32>
    %305 = tpu.reciprocal %304 {approx = true} : vector<7x1xf32> -> vector<7x1xf32>
    %306 = vector.broadcast %305 : vector<7x1xf32> to vector<7x7xf32>
    %307 = arith.mulf %302, %306 : vector<7x7xf32>
    %c0_115 = arith.constant 0 : index
    %c0_116 = arith.constant 0 : index
    %c0_117 = arith.constant 0 : index
    %c0_118 = arith.constant 0 : index
    %308 = vector.load %arg26[%c0_115, %c0_116, %c0_117, %c0_118] : memref<1x2x7x7xf32, #tpu.memory_space<vmem>>, vector<1x1x7x7xf32>
    %309 = vector.shape_cast %308 : vector<1x1x7x7xf32> to vector<7x7xf32>
    %310 = vector.shape_cast %307 : vector<7x7xf32> to vector<1x1x7x7xf32>
    tpu.vector_store %arg26[%c0_115, %c0_116, %c0_117, %c0_118], %310 {strides = array<i32>} : memref<1x2x7x7xf32, #tpu.memory_space<vmem>>, vector<1x1x7x7xf32>,
    %cst_119 = arith.constant dense<0.000000e+00> : vector<7x16xf32>
    %311 = tpu.matmul %307, %296, %cst_119 {dimension_numbers = #tpu.dot_dimension_numbers<[1], [0], [0], [1], [0, 0, 1, 1], [], []>} : vector<7x7xf32>, vector<7x16xf32>, vector<7x16xf32> -> vector<7x16xf32>
    %312 = vector.extract_strided_slice %288 {offsets = [32, 0], sizes = [16, 32], strides = [1, 1]} : vector<64x32xf32> to vector<16x32xf32>
    %cst_120 = arith.constant dense<0.000000e+00> : vector<7x32xf32>
    %313 = tpu.matmul %311, %312, %cst_120 {dimension_numbers = #tpu.dot_dimension_numbers<[1], [0], [0], [1], [0, 0, 1, 1], [], []>} : vector<7x16xf32>, vector<16x32xf32>, vector<7x32xf32> -> vector<7x32xf32>
    %314 = arith.addf %291, %313 : vector<7x32xf32>
    %315 = vector.extract_strided_slice %287 {offsets = [0, 16], sizes = [7, 16], strides = [1, 1]} : vector<7x96xf32> to vector<7x16xf32>
    %cst_121 = arith.constant 2.500000e-01 : f32
    %316 = vector.broadcast %cst_121 : f32 to vector<7x16xf32>
    %317 = arith.mulf %315, %316 : vector<7x16xf32>
    %318 = vector.extract_strided_slice %287 {offsets = [0, 48], sizes = [7, 16], strides = [1, 1]} : vector<7x96xf32> to vector<7x16xf32>
    %319 = vector.extract_strided_slice %287 {offsets = [0, 80], sizes = [7, 16], strides = [1, 1]} : vector<7x96xf32> to vector<7x16xf32>
    %cst_122 = arith.constant dense<0.000000e+00> : vector<7x7xf32>
    %320 = tpu.matmul %317, %318, %cst_122 {dimension_numbers = #tpu.dot_dimension_numbers<[1], [1], [0], [0], [0, 0, 1, 0], [], []>} : vector<7x16xf32>, vector<7x16xf32>, vector<7x7xf32> -> vector<7x7xf32>
    %cst_123 = arith.constant dense<0xFF800000> : vector<7xf32>
    %321 = vector.multi_reduction <maximumf>, %320, %cst_123 [1] : vector<7x7xf32> to vector<7xf32>
    %322 = vector.shape_cast %321 : vector<7xf32> to vector<7x1xf32>
    %323 = vector.broadcast %322 : vector<7x1xf32> to vector<7x7xf32>
    %324 = arith.subf %320, %323 : vector<7x7xf32>
    %325 = math.exp %324 : vector<7x7xf32>
    %cst_124 = arith.constant dense<0.000000e+00> : vector<7xf32>
    %326 = vector.multi_reduction <add>, %325, %cst_124 [1] : vector<7x7xf32> to vector<7xf32>
    %327 = vector.shape_cast %326 : vector<7xf32> to vector<7x1xf32>
    %328 = tpu.reciprocal %327 {approx = true} : vector<7x1xf32> -> vector<7x1xf32>
    %329 = vector.broadcast %328 : vector<7x1xf32> to vector<7x7xf32>
    %330 = arith.mulf %325, %329 : vector<7x7xf32>
    %c0_125 = arith.constant 0 : index
    %c1_126 = arith.constant 1 : index
    %c0_127 = arith.constant 0 : index
    %c0_128 = arith.constant 0 : index
    %331 = vector.load %arg26[%c0_125, %c1_126, %c0_127, %c0_128] : memref<1x2x7x7xf32, #tpu.memory_space<vmem>>, vector<1x1x7x7xf32>
    %332 = vector.shape_cast %331 : vector<1x1x7x7xf32> to vector<7x7xf32>
    %333 = vector.shape_cast %330 : vector<7x7xf32> to vector<1x1x7x7xf32>
    tpu.vector_store %arg26[%c0_125, %c1_126, %c0_127, %c0_128], %333 {strides = array<i32>} : memref<1x2x7x7xf32, #tpu.memory_space<vmem>>, vector<1x1x7x7xf32>,
    %cst_129 = arith.constant dense<0.000000e+00> : vector<7x16xf32>
    %334 = tpu.matmul %330, %319, %cst_129 {dimension_numbers = #tpu.dot_dimension_numbers<[1], [0], [0], [1], [0, 0, 1, 1], [], []>} : vector<7x7xf32>, vector<7x16xf32>, vector<7x16xf32> -> vector<7x16xf32>
    %335 = vector.extract_strided_slice %288 {offsets = [48, 0], sizes = [16, 32], strides = [1, 1]} : vector<64x32xf32> to vector<16x32xf32>
    %cst_130 = arith.constant dense<0.000000e+00> : vector<7x32xf32>
    %336 = tpu.matmul %334, %335, %cst_130 {dimension_numbers = #tpu.dot_dimension_numbers<[1], [0], [0], [1], [0, 0, 1, 1], [], []>} : vector<7x16xf32>, vector<16x32xf32>, vector<7x32xf32> -> vector<7x32xf32>
    %337 = arith.addf %314, %336 : vector<7x32xf32>
    %c0_131 = arith.constant 0 : index
    %c0_132 = arith.constant 0 : index
    %338 = vector.load %arg17[%c0_131, %c0_132] : memref<1x32xf32, #tpu.memory_space<vmem>>, vector<1x32xf32>
    %c0_133 = arith.constant 0 : index
    %c0_134 = arith.constant 0 : index
    %339 = vector.load %arg18[%c0_133, %c0_134] : memref<1x32xf32, #tpu.memory_space<vmem>>, vector<1x32xf32>
    %cst_135 = arith.constant dense<0.000000e+00> : vector<7xf32>
    %340 = vector.multi_reduction <add>, %337, %cst_135 [1] : vector<7x32xf32> to vector<7xf32>
    %341 = vector.shape_cast %340 : vector<7xf32> to vector<7x1xf32>
    %cst_136 = arith.constant 3.200000e+01 : f32
    %342 = vector.broadcast %cst_136 : f32 to vector<7x1xf32>
    %343 = arith.divf %341, %342 : vector<7x1xf32>
    %344 = vector.broadcast %343 : vector<7x1xf32> to vector<7x32xf32>
    %345 = arith.subf %337, %344 : vector<7x32xf32>
    %346 = arith.mulf %345, %345 : vector<7x32xf32>
    %cst_137 = arith.constant dense<0.000000e+00> : vector<7xf32>
    %347 = vector.multi_reduction <add>, %346, %cst_137 [1] : vector<7x32xf32> to vector<7xf32>
    %348 = vector.shape_cast %347 : vector<7xf32> to vector<7x1xf32>
    %cst_138 = arith.constant 3.200000e+01 : f32
    %349 = vector.broadcast %cst_138 : f32 to vector<7x1xf32>
    %350 = arith.divf %348, %349 : vector<7x1xf32>
    %351 = vector.broadcast %343 : vector<7x1xf32> to vector<7x32xf32>
    %352 = arith.subf %337, %351 : vector<7x32xf32>
    %cst_139 = arith.constant 9.99999997E-7 : f32
    %353 = vector.broadcast %cst_139 : f32 to vector<7x1xf32>
    %354 = arith.addf %350, %353 : vector<7x1xf32>
    %355 = math.rsqrt %354 : vector<7x1xf32>
    %356 = vector.broadcast %355 : vector<7x1xf32> to vector<7x32xf32>
    %357 = arith.mulf %352, %356 : vector<7x32xf32>
    %358 = vector.broadcast %338 : vector<1x32xf32> to vector<7x32xf32>
    %359 = arith.mulf %357, %358 : vector<7x32xf32>
    %360 = vector.broadcast %339 : vector<1x32xf32> to vector<7x32xf32>
    %361 = arith.addf %359, %360 : vector<7x32xf32>
    %c0_140 = arith.constant 0 : index
    %c0_141 = arith.constant 0 : index
    %362 = vector.load %arg19[%c0_140, %c0_141] : memref<32x64xf32, #tpu.memory_space<vmem>>, vector<32x64xf32>
    %cst_142 = arith.constant dense<0.000000e+00> : vector<7x64xf32>
    %363 = tpu.matmul %361, %362, %cst_142 {dimension_numbers = #tpu.dot_dimension_numbers<[1], [0], [0], [1], [0, 0, 1, 1], [], []>} : vector<7x32xf32>, vector<32x64xf32>, vector<7x64xf32> -> vector<7x64xf32>
    %c0_143 = arith.constant 0 : index
    %c0_144 = arith.constant 0 : index
    %364 = vector.load %arg20[%c0_143, %c0_144] : memref<1x64xf32, #tpu.memory_space<vmem>>, vector<1x64xf32>
    %365 = vector.broadcast %364 : vector<1x64xf32> to vector<7x64xf32>
    %366 = arith.addf %363, %365 : vector<7x64xf32>
    %cst_145 = arith.constant 0.000000e+00 : f32
    %367 = vector.broadcast %cst_145 : f32 to vector<7x64xf32>
    %368 = arith.maximumf %366, %367 : vector<7x64xf32>
    %c0_146 = arith.constant 0 : index
    %c0_147 = arith.constant 0 : index
    %369 = vector.load %arg21[%c0_146, %c0_147] : memref<64x32xf32, #tpu.memory_space<vmem>>, vector<64x32xf32>
    %cst_148 = arith.constant dense<0.000000e+00> : vector<7x32xf32>
    %370 = tpu.matmul %368, %369, %cst_148 {dimension_numbers = #tpu.dot_dimension_numbers<[1], [0], [0], [1], [0, 0, 1, 1], [], []>} : vector<7x64xf32>, vector<64x32xf32>, vector<7x32xf32> -> vector<7x32xf32>
    %c0_149 = arith.constant 0 : index
    %c0_150 = arith.constant 0 : index
    %371 = vector.load %arg22[%c0_149, %c0_150] : memref<1x32xf32, #tpu.memory_space<vmem>>, vector<1x32xf32>
    %372 = vector.broadcast %371 : vector<1x32xf32> to vector<7x32xf32>
    %373 = arith.addf %370, %372 : vector<7x32xf32>
    %374 = arith.addf %373, %361 : vector<7x32xf32>
    %c0_151 = arith.constant 0 : index
    %c0_152 = arith.constant 0 : index
    %375 = vector.load %arg23[%c0_151, %c0_152] : memref<1x32xf32, #tpu.memory_space<vmem>>, vector<1x32xf32>
    %c0_153 = arith.constant 0 : index
    %c0_154 = arith.constant 0 : index
    %376 = vector.load %arg24[%c0_153, %c0_154] : memref<1x32xf32, #tpu.memory_space<vmem>>, vector<1x32xf32>
    %cst_155 = arith.constant dense<0.000000e+00> : vector<7xf32>
    %377 = vector.multi_reduction <add>, %374, %cst_155 [1] : vector<7x32xf32> to vector<7xf32>
    %378 = vector.shape_cast %377 : vector<7xf32> to vector<7x1xf32>
    %cst_156 = arith.constant 3.200000e+01 : f32
    %379 = vector.broadcast %cst_156 : f32 to vector<7x1xf32>
    %380 = arith.divf %378, %379 : vector<7x1xf32>
    %381 = vector.broadcast %380 : vector<7x1xf32> to vector<7x32xf32>
    %382 = arith.subf %374, %381 : vector<7x32xf32>
    %383 = arith.mulf %382, %382 : vector<7x32xf32>
    %cst_157 = arith.constant dense<0.000000e+00> : vector<7xf32>
    %384 = vector.multi_reduction <add>, %383, %cst_157 [1] : vector<7x32xf32> to vector<7xf32>
    %385 = vector.shape_cast %384 : vector<7xf32> to vector<7x1xf32>
    %cst_158 = arith.constant 3.200000e+01 : f32
    %386 = vector.broadcast %cst_158 : f32 to vector<7x1xf32>
    %387 = arith.divf %385, %386 : vector<7x1xf32>
    %388 = vector.broadcast %380 : vector<7x1xf32> to vector<7x32xf32>
    %389 = arith.subf %374, %388 : vector<7x32xf32>
    %cst_159 = arith.constant 9.99999997E-7 : f32
    %390 = vector.broadcast %cst_159 : f32 to vector<7x1xf32>
    %391 = arith.addf %387, %390 : vector<7x1xf32>
    %392 = math.rsqrt %391 : vector<7x1xf32>
    %393 = vector.broadcast %392 : vector<7x1xf32> to vector<7x32xf32>
    %394 = arith.mulf %389, %393 : vector<7x32xf32>
    %395 = vector.broadcast %375 : vector<1x32xf32> to vector<7x32xf32>
    %396 = arith.mulf %394, %395 : vector<7x32xf32>
    %397 = vector.broadcast %376 : vector<1x32xf32> to vector<7x32xf32>
    %398 = arith.addf %396, %397 : vector<7x32xf32>
    %c0_160 = arith.constant 0 : index
    %c0_161 = arith.constant 0 : index
    %c0_162 = arith.constant 0 : index
    %399 = vector.load %arg25[%c0_160, %c0_161, %c0_162] : memref<1x7x32xf32, #tpu.memory_space<vmem>>, vector<1x7x32xf32>
    %400 = vector.shape_cast %399 : vector<1x7x32xf32> to vector<7x32xf32>
    %401 = vector.shape_cast %398 : vector<7x32xf32> to vector<1x7x32xf32>
    tpu.vector_store %arg25[%c0_160, %c0_161, %c0_162], %401 {strides = array<i32>} : memref<1x7x32xf32, #tpu.memory_space<vmem>>, vector<1x7x32xf32>,
    return
  }
  func.func @transform_0(%arg0: i32) -> (i32, i32, i32) {
    %c0_i32 = arith.constant 0 : i32
    %c0_i32_0 = arith.constant 0 : i32
    %c0_i32_1 = arith.constant 0 : i32
    return %arg0, %c0_i32, %c0_i32_0 : i32, i32, i32
  }
  func.func @transform_1(%arg0: i32) -> (i32, i32, i32) {
    %c0_i32 = arith.constant 0 : i32
    %c0_i32_0 = arith.constant 0 : i32
    %c0_i32_1 = arith.constant 0 : i32
    return %arg0, %c0_i32, %c0_i32_0 : i32, i32, i32
  }
  func.func @transform_2(%arg0: i32) -> (i32, i32) {
    %c0_i32 = arith.constant 0 : i32
    %c0_i32_0 = arith.constant 0 : i32
    %c0_i32_1 = arith.constant 0 : i32
    return %c0_i32, %c0_i32_0 : i32, i32
  }
  func.func @transform_3(%arg0: i32) -> (i32, i32) {
    %c0_i32 = arith.constant 0 : i32
    %c0_i32_0 = arith.constant 0 : i32
    %c0_i32_1 = arith.constant 0 : i32
    return %c0_i32, %c0_i32_0 : i32, i32
  }
  func.func @transform_4(%arg0: i32) -> (i32, i32) {
    %c0_i32 = arith.constant 0 : i32
    %c0_i32_0 = arith.constant 0 : i32
    %c0_i32_1 = arith.constant 0 : i32
    return %c0_i32, %c0_i32_0 : i32, i32
  }
  func.func @transform_5(%arg0: i32) -> (i32, i32) {
    %c0_i32 = arith.constant 0 : i32
    %c0_i32_0 = arith.constant 0 : i32
    %c0_i32_1 = arith.constant 0 : i32
    return %c0_i32, %c0_i32_0 : i32, i32
  }
  func.func @transform_6(%arg0: i32) -> (i32, i32) {
    %c0_i32 = arith.constant 0 : i32
    %c0_i32_0 = arith.constant 0 : i32
    %c0_i32_1 = arith.constant 0 : i32
    return %c0_i32, %c0_i32_0 : i32, i32
  }
  func.func @transform_7(%arg0: i32) -> (i32, i32) {
    %c0_i32 = arith.constant 0 : i32
    %c0_i32_0 = arith.constant 0 : i32
    %c0_i32_1 = arith.constant 0 : i32
    return %c0_i32, %c0_i32_0 : i32, i32
  }
  func.func @transform_8(%arg0: i32) -> (i32, i32) {
    %c0_i32 = arith.constant 0 : i32
    %c0_i32_0 = arith.constant 0 : i32
    %c0_i32_1 = arith.constant 0 : i32
    return %c0_i32, %c0_i32_0 : i32, i32
  }
  func.func @transform_9(%arg0: i32) -> (i32, i32) {
    %c0_i32 = arith.constant 0 : i32
    %c0_i32_0 = arith.constant 0 : i32
    %c0_i32_1 = arith.constant 0 : i32
    return %c0_i32, %c0_i32_0 : i32, i32
  }
  func.func @transform_10(%arg0: i32) -> (i32, i32) {
    %c0_i32 = arith.constant 0 : i32
    %c0_i32_0 = arith.constant 0 : i32
    %c0_i32_1 = arith.constant 0 : i32
    return %c0_i32, %c0_i32_0 : i32, i32
  }
  func.func @transform_11(%arg0: i32) -> (i32, i32) {
    %c0_i32 = arith.constant 0 : i32
    %c0_i32_0 = arith.constant 0 : i32
    %c0_i32_1 = arith.constant 0 : i32
    return %c0_i32, %c0_i32_0 : i32, i32
  }
  func.func @transform_12(%arg0: i32) -> (i32, i32) {
    %c0_i32 = arith.constant 0 : i32
    %c0_i32_0 = arith.constant 0 : i32
    %c0_i32_1 = arith.constant 0 : i32
    return %c0_i32, %c0_i32_0 : i32, i32
  }
  func.func @transform_13(%arg0: i32) -> (i32, i32) {
    %c0_i32 = arith.constant 0 : i32
    %c0_i32_0 = arith.constant 0 : i32
    %c0_i32_1 = arith.constant 0 : i32
    return %c0_i32, %c0_i32_0 : i32, i32
  }
  func.func @transform_14(%arg0: i32) -> (i32, i32) {
    %c0_i32 = arith.constant 0 : i32
    %c0_i32_0 = arith.constant 0 : i32
    %c0_i32_1 = arith.constant 0 : i32
    return %c0_i32, %c0_i32_0 : i32, i32
  }
  func.func @transform_15(%arg0: i32) -> (i32, i32) {
    %c0_i32 = arith.constant 0 : i32
    %c0_i32_0 = arith.constant 0 : i32
    %c0_i32_1 = arith.constant 0 : i32
    return %c0_i32, %c0_i32_0 : i32, i32
  }
  func.func @transform_16(%arg0: i32) -> (i32, i32) {
    %c0_i32 = arith.constant 0 : i32
    %c0_i32_0 = arith.constant 0 : i32
    %c0_i32_1 = arith.constant 0 : i32
    return %c0_i32, %c0_i32_0 : i32, i32
  }
  func.func @transform_17(%arg0: i32) -> (i32, i32) {
    %c0_i32 = arith.constant 0 : i32
    %c0_i32_0 = arith.constant 0 : i32
    %c0_i32_1 = arith.constant 0 : i32
    return %c0_i32, %c0_i32_0 : i32, i32
  }
  func.func @transform_18(%arg0: i32) -> (i32, i32) {
    %c0_i32 = arith.constant 0 : i32
    %c0_i32_0 = arith.constant 0 : i32
    %c0_i32_1 = arith.constant 0 : i32
    return %c0_i32, %c0_i32_0 : i32, i32
  }
  func.func @transform_19(%arg0: i32) -> (i32, i32) {
    %c0_i32 = arith.constant 0 : i32
    %c0_i32_0 = arith.constant 0 : i32
    %c0_i32_1 = arith.constant 0 : i32
    return %c0_i32, %c0_i32_0 : i32, i32
  }
  func.func @transform_20(%arg0: i32) -> (i32, i32) {
    %c0_i32 = arith.constant 0 : i32
    %c0_i32_0 = arith.constant 0 : i32
    %c0_i32_1 = arith.constant 0 : i32
    return %c0_i32, %c0_i32_0 : i32, i32
  }
  func.func @transform_21(%arg0: i32) -> (i32, i32) {
    %c0_i32 = arith.constant 0 : i32
    %c0_i32_0 = arith.constant 0 : i32
    %c0_i32_1 = arith.constant 0 : i32
    return %c0_i32, %c0_i32_0 : i32, i32
  }
  func.func @transform_22(%arg0: i32) -> (i32, i32) {
    %c0_i32 = arith.constant 0 : i32
    %c0_i32_0 = arith.constant 0 : i32
    %c0_i32_1 = arith.constant 0 : i32
    return %c0_i32, %c0_i32_0 : i32, i32
  }
  func.func @transform_23(%arg0: i32) -> (i32, i32) {
    %c0_i32 = arith.constant 0 : i32
    %c0_i32_0 = arith.constant 0 : i32
    %c0_i32_1 = arith.constant 0 : i32
    return %c0_i32, %c0_i32_0 : i32, i32
  }
  func.func @transform_24(%arg0: i32) -> (i32, i32, i32) {
    %c0_i32 = arith.constant 0 : i32
    %c0_i32_0 = arith.constant 0 : i32
    %c0_i32_1 = arith.constant 0 : i32
    return %arg0, %c0_i32, %c0_i32_0 : i32, i32, i32
  }
  func.func @transform_25(%arg0: i32) -> (i32, i32, i32, i32) {
    %c0_i32 = arith.constant 0 : i32
    %c0_i32_0 = arith.constant 0 : i32
    %c0_i32_1 = arith.constant 0 : i32
    %c0_i32_2 = arith.constant 0 : i32
    return %arg0, %c0_i32, %c0_i32_0, %c0_i32_1 : i32, i32, i32, i32
  }
}

</mosaic_0001>

<bundles_post_ra>
// kernel: tpu_custom_call.1
= control target key start
LH: loop header
LB: loop body
LE: loop exit
PB: predicated region body
PF: predicated region fallthrough
CT: control target
= control target key end

     0   :  { %s2191_s29 = smov 0   ;;  %s2555_s0 = inlined_call_operand.vmem [shape: f32[2,7,32], index: 0, kind: input, shape index: {}]   ;;  %s2556_s1 = inlined_call_operand.vmem [shape: f32[2,7,7], index: 1, kind: input, shape index: {}]   ;;  %s2557_s2 = inlined_call_operand.vmem [shape: f32[32,64], index: 2, kind: input, shape index: {}]   ;;  %s2558_s3 = inlined_call_operand.vmem [shape: f32[2,32], index: 3, kind: input, shape index: {}]   ;;  %s2559_s4 = inlined_call_operand.vmem [shape: f32[32,2], index: 4, kind: input, shape index: {}]   ;;  %s2560_s5 = inlined_call_operand.vmem [shape: f32[1,32], index: 5, kind: input, shape index: {}]   ;;  %s2561_s6 = inlined_call_operand.vmem [shape: f32[32,64], index: 6, kind: input, shape index: {}]   ;;  %s2562_s7 = inlined_call_operand.vmem [shape: f32[2,32], index: 7, kind: input, shape index: {}]   ;;  %s2563_s8 = inlined_call_operand.vmem [shape: f32[32,2], index: 8, kind: input, shape index: {}]   ;;  %s2564_s9 = inlined_call_operand.vmem [shape: f32[1,32], index: 9, kind: input, shape index: {}]   ;;  %s2565_s10 = inlined_call_operand.vmem [shape: f32[32,96], index: 10, kind: input, shape index: {}]   ;;  %s2566_s11 = inlined_call_operand.vmem [shape: f32[2,32], index: 11, kind: input, shape index: {}]   ;;  %s2567_s12 = inlined_call_operand.vmem [shape: f32[32,2], index: 12, kind: input, shape index: {}]   ;;  %s2568_s13 = inlined_call_operand.vmem [shape: f32[1,32], index: 13, kind: input, shape index: {}]   ;;  %s2569_s14 = inlined_call_operand.vmem [shape: f32[32,96], index: 14, kind: input, shape index: {}]   ;;  %s2570_s15 = inlined_call_operand.vmem [shape: f32[64,32], index: 15, kind: input, shape index: {}]   ;;  %s2571_s16 = inlined_call_operand.vmem [shape: f32[1,32], index: 16, kind: input, shape index: {}]   ;;  %s2572_s17 = inlined_call_operand.vmem [shape: f32[1,32], index: 17, kind: input, shape index: {}]   ;;  %s2573_s18 = inlined_call_operand.vmem [shape: f32[32,64], index: 18, kind: input, shape index: {}]   ;;  %s2574_s19 = inlined_call_operand.vmem [shape: f32[1,64], index: 19, kind: input, shape index: {}]   ;;  %s2575_s20 = inlined_call_operand.vmem [shape: f32[64,32], index: 20, kind: input, shape index: {}]   ;;  %s2576_s21 = inlined_call_operand.vmem [shape: f32[1,32], index: 21, kind: input, shape index: {}]   ;;  %s2577_s22 = inlined_call_operand.vmem [shape: f32[1,32], index: 22, kind: input, shape index: {}]   ;;  %s2578_s23 = inlined_call_operand.vmem [shape: f32[1,32], index: 23, kind: input, shape index: {}]   ;;  %s2579_s24 = inlined_call_operand.vmem [shape: f32[2,7,32], index: 24, kind: output, shape index: {0}]   ;;  %s2580_s25 = inlined_call_operand.vmem [shape: f32[2,2,7,7], index: 25, kind: output, shape index: {1}]  }
   0x1   :  { %2594 = sst [smem:[#allocation2_spill]] %s2555_s0 }
   0x2   :  { %2595 = sst [smem:[#allocation3_spill]] %s2556_s1 }
   0x3   :  { %2596 = sst [smem:[#allocation4_spill]] %s2557_s2 }
   0x4   :  { %2597 = sst [smem:[#allocation5_spill]] %s2558_s3 }
   0x5   :  { %2598 = sst [smem:[#allocation6_spill]] %s2559_s4 }
   0x6   :  { %2599 = sst [smem:[#allocation7_spill]] %s2560_s5 }
   0x7   :  { %2600 = sst [smem:[#allocation8_spill]] %s2561_s6 }
   0x8   :  { %2601 = sst [smem:[#allocation9_spill]] %s2562_s7 }
   0x9   :  { %2602 = sst [smem:[#allocation10_spill]] %s2563_s8 }
   0xa   :  { %2603 = sst [smem:[#allocation11_spill]] %s2564_s9 }
   0xb LB: > { %s1916_s2 = sadd.s32 4294967295, %s2052_s29   ;;  %p1920_p0 = scmp.ge.s32.totalorder %s2052_s29, 1  ;;  %s2052_s29 = sphi %s2191_s29, %s36_s29  }
   0xc   : > { %p698_p1 = scmp.lt.s32.totalorder %s2052_s29, 3 }
   0xe   : > { %p699_p2 = pnand %p1920_p0, %p698_p1 }
   0xf   : > { %s2604_s7 = sld [smem:[#allocation6_spill]] (!%p699_p2)  ;;  %p773_p3 = scmp.lt.s32.totalorder (!%p699_p2), %s1916_s2, 1 }
  0x10   : > { %702 = sbr.rel (%p699_p2) target bundleno = 3858 (0xf12), region = 116  ;;  %s2605_s0 = sld [smem:[#allocation2_spill]] (!%p699_p2) }
  0x11   : > { %s2606_s26 = sld [smem:[#allocation5_spill]] (!%p699_p2)  ;;  %s2613_s9 = smov (!%p699_p2), 96  }
  0x12   : > { %s2607_s27 = sld [smem:[#allocation3_spill]] (!%p699_p2) }
  0x13   : > { %s2609_s3 = sld [smem:[#allocation8_spill]] (!%p699_p2) }
  0x14   : > { %s2612_s30 = sld [smem:[#allocation9_spill]] (!%p699_p2) }
  0x15   : > { %v824_v0 = vld [vmem:[%s2604_s7 + $0x18] sm:$0xff]  ;;  %v823_v1 = vld [vmem:[%s2604_s7 + $0x10] sm:$0xff]  ;;  %v822_v2 = vld [vmem:[%s2604_s7 + $0x8] sm:$0xff]  ;;  %s2616_s2 = smov (!%p773_p3, %s1916_s2), 1  ;;  %vm797_vm0 = vcmask 261120   ;;  %v845_v6 = vlaneseq  ;;  %v2054_v8 = vmov 0.0  }
  0x16   : > { %837 = vmatpush.msra.mxu1 %v824_v0  ;;  %v821_v3 = vld [vmem:[%s2604_s7] sm:$0xff]  ;;  %s2214_s28 = sshll.u32 %s2616_s2, 3  ;;  %vm851_vm2 = vcmask 14336   ;;  %vm885_vm5 = vcmask 55296   ;;  %vm901_vm7 = vcmask 1046528   ;;  %vm897_vm8 = vcmask 56320  }
  0x17   : > { %s776_s6 = scalar_lea.vmem %s2605_s0, %s2214_s28  ;;  %v855_v5 = vld [vmem:[%s2606_s26] sm:$0x1]  ;;  %v2230_v7 = vand.u32 127, %v845_v6  ;;  %s2608_s0 = sld [smem:[#allocation4_spill]]  ;;  %v938_v38 = vld [vmem:[%s2606_s26 + $0x1] sm:$0x1] }
  0x18   : > { %838 = vmatpush.msra.mxu1 %v823_v1  ;;  %v2220_v4 = vld [vmem:[%s776_s6] sm:$0x7f]  ;;  %s780_s4 = scalar_lea.vmem %s2607_s27, %s2214_s28  ;;  %s2610_s27 = sld [smem:[#allocation10_spill]] }
  0x19   : > { %1929 = vmatpush.xpose.msk.msra.mxu2 %vm797_vm0, %v2220_v4  ;;  %vm847_vm1 = vcmp.eq.s32.totalorder %v2230_v7, 0  ;;  %v2242_v16 = vld [vmem:[%s780_s4] sm:$0x7f]  ;;  %vm931_vm6 = vcmp.eq.s32.totalorder %v2230_v7, 1  ;;  %s2587_s4 = smov 96   ;;  %v1027_v56 = vld [vmem:[%s2609_s3 + $0x18] sm:$0xff] }
  0x1a   : > { %839 = vmatpush.msra.mxu1 %v822_v2  ;;  %v2234_v9 = vsel %vm847_vm1, 1.0, %v2054_v8  ;;  %vm792_vm3 = vcmp.gt.f32.partialorder %v2242_v16, 0.0  ;;  %v2265_v31 = vsel %vm931_vm6, 1.0, %v2054_v8  ;;  %v1026_v58 = vld [vmem:[%s2609_s3 + $0x10] sm:$0xff]  ;;  %v1025_v60 = vld [vmem:[%s2609_s3 + $0x8] sm:$0xff]  ;;  %v1024_v62 = vld [vmem:[%s2609_s3] sm:$0xff]  ;;  %s784_s3 = scalar_lea.vmem %s2579_s24, %s2214_s28 }
  0x1b   : > { %vm1002_vm10 = vcmp.ge.s32.totalorder %v2230_v7, 16  ;;  %vm1003_vm11 = vcmp.lt.s32.totalorder %v2230_v7, 32  ;;  %vm926_vm12 = vcmp.lt.s32.totalorder %v2230_v7, 16  ;;  %s2614_s1 = sld [smem:[#allocation11_spill]]  ;;  %s2056_s7 = smov 80  }
  0x1c   : > { %840 = vmatpush.msra.mxu1 %v821_v3  ;;  %1930 = vmatmul.msk.f32.vlgmr.msra.gmra.mxu2 %vm797_vm0, %v855_v5  ;;  %vm1004_vm13 = vmand %vm1002_vm10, %vm1003_vm11  ;;  %v2312_v0 = vsel %vm926_vm12, 1.0, %v2054_v8  ;;  %s2057_s26 = smov 64  }
  0x1d   : > { %1927 = vmatmul.msk.f32.vlgmr.msra.gmra.mxu1 %vm797_vm0, %v2220_v4  ;;  %v796_v22 = vld [vmem:[%s2608_s0 + $0x18] sm:$0xff]  ;;  %v795_v23 = vld [vmem:[%s2608_s0 + $0x10] sm:$0xff]  ;;  %v794_v24 = vld [vmem:[%s2608_s0 + $0x8] sm:$0xff]  ;;  %v2315_v1 = vsel %vm1004_vm13, 1.0, %v2054_v8 }
  0x1e   : > { %813 = vmatpush.msra.mxu0 %v796_v22  ;;  %v793_v25 = vld [vmem:[%s2608_s0] sm:$0xff]  ;;  %v1054_v57 = vld [vmem:[%s2610_s27 + $0x18] sm:$0xff]  ;;  %v1053_v59 = vld [vmem:[%s2610_s27 + $0x10] sm:$0xff]  ;;  %s2611_s0 = sld [smem:[#allocation7_spill]] }
  0x1f   : > { %v1052_v61 = vld [vmem:[%s2610_s27 + $0x8] sm:$0xff]  ;;  %v1051_v63 = vld [vmem:[%s2610_s27] sm:$0xff] }
  0x20   : > { %814 = vmatpush.msra.mxu0 %v795_v23 }
  0x22   : > { %815 = vmatpush.msra.mxu0 %v794_v24 }
  0x24   : > { %816 = vmatpush.msra.mxu0 %v793_v25 }
  0x25   : > { %1926 = vmatmul.msk.f32.vlgmr.msra.gmra.mxu0 %vm797_vm0, %v2220_v4 }
  0x26   : > { %1043 = vmatpush.msrb.mxu0 %v1027_v56 }
  0x28   : > { %1044 = vmatpush.msrb.mxu0 %v1026_v58 }
  0x2a   : > { %1045 = vmatpush.msrb.mxu0 %v1025_v60  ;;  %v1262_v60 = vld [vmem:[%s2567_s12 + $0x18] sm:$0xff] }
  0x2c   : > { %1046 = vmatpush.msrb.mxu0 %v1024_v62  ;;  %v1261_v62 = vld [vmem:[%s2567_s12 + $0x10] sm:$0xff] }
  0x9a   : > { %v842_v10 = vpop.f32.mrf.mxu1 }
  0x9b   : > { %v850_v11 = vmul.f32 %v2234_v9, %v842_v10  ;;  %v934_v32 = vmul.f32 %v2265_v31, %v842_v10  ;;  %v1995_v10 = vld [vmem:[%s2611_s0] ss:$0 sm:$0xff]  ;;  %s2058_s0 = smov 112  }
  0x9d   : > { %v852_v12 = vsel %vm851_vm2, %v850_v11, 0.0  ;;  %v935_v33 = vsel %vm851_vm2, %v934_v32, 0.0 }
  0x9e   : > { %853 = vadd.xlane.f32.xlu0 %v852_v12 }
  0x9f   : > { %v876_v13 = vpop.f32.mrf.mxu2 }
  0xa0   : > { %v879_v14 = vperm.slane %v876_v13, 0 }
  0xa2   : > { %v818_v34 = vpop.f32.mrf.mxu0 }
  0xa3   : > { %1931 = vmatpush.msk.msra.mxu3 %vm901_vm7, %v818_v34  ;;  %1937 = vmatpush.msk.msrb.mxu2 %vm901_vm7, %v818_v34 }
  0xa5   : > { %1935 = vmatpush.xpose.msk.msrb.mxu3 %vm797_vm0, %v2220_v4 }
 0x111   : > { %v854_v15 = vpop.xlane.xlu0 %853 }
 0x112   : > { %v880_v17 = vadd.f32 %v879_v14, %v854_v15 }
 0x114   : > { %v882_v18 = vmul.f32 0.2, %v880_v17  ;;  %vm881_vm4 = vcmp.gt.f32.partialorder %v880_v17, 0.0 }
 0x116   : > { %v883_v19 = vsel %vm881_vm4, %v880_v17, %v882_v18  ;;  %v1079_v18 = vld [vmem:[%s2612_s30] sm:$0x1] }
 0x117   : > { %v884_v20 = vsel %vm792_vm3, %v883_v19, -1e+30  ;;  %v1151_v19 = vld [vmem:[%s2612_s30 + $0x1] sm:$0x1] }
 0x118   : > { %v886_v21 = vsel %vm885_vm5, %v884_v20, -inf }
 0x119   : > { %887 = vmax.xlane.f32.xlu0 %v886_v21 }
 0x12d   : > { %1009 = vrot.lane.b32.xlu0 %v818_v34, %s2587_s4  ;;  %s1979_s4 = sshll.u32 %s2616_s2, 4 }
 0x12e   : > { %s789_s27 = scalar_lea.vmem %s2580_s25, %s1979_s4 }
 0x18c   : > { %v888_v26 = vpop.xlane.xlu0 %887 }
 0x18d   : > { %v889_v27 = vsub.f32 %v884_v20, %v888_v26 }
 0x18f   : > { %v890_v28 = vmul.f32 1.442695, %v889_v27 }
 0x191   : > { %2004 = vpow2.f32 %v890_v28 }
 0x197   : > { %v2005_v29 = vpop.eup %2004 }
 0x198   : > { %v892_v30 = vsel %vm885_vm5, %v2005_v29, 0.0 }
 0x199   : > { %893 = vadd.xlane.f32.xlu1 %v892_v30 }
 0x19f   : > { %v1010_v11 = vpop.permute.xlu0 %1009 }
 0x1a1   : > { %936 = vadd.xlane.f32.xlu1 %v935_v33 }
 0x20c   : > { %v894_v35 = vpop.xlane.xlu1 %893 }
 0x20d   : > { %2006 = vrcp.f32 %v894_v35 }
 0x213   : > { %v2007_v36 = vpop.eup %2006 }
 0x214   : > { %v896_v37 = vmul.f32 %v2007_v36, %v2005_v29  ;;  %v937_v42 = vpop.xlane.xlu1 %936 }
 0x216   : > { %1932 = vmatmul.msk.f32.vlgmr.msra.gmra.mxu3 %vm897_vm8, %v896_v37 }
 0x217   : > { %1067 = vmatpush.msra.mxu3 %v1054_v57 }
 0x219   : > { %1068 = vmatpush.msra.mxu3 %v1053_v59  ;;  %v1235_v59 = vld [vmem:[%s2565_s10 + $0x18] sm:$0xff] }
 0x21b   : > { %1069 = vmatpush.msra.mxu3 %v1052_v61  ;;  %v1234_v61 = vld [vmem:[%s2565_s10 + $0x10] sm:$0xff] }
 0x21d   : > { %1070 = vmatpush.msra.mxu3 %v1051_v63  ;;  %v1233_v63 = vld [vmem:[%s2565_s10 + $0x8] sm:$0xff] }
 0x21e   : > { %1936 = vmatmul.msk.f32.vlgmr.msrb.gmra.mxu3 %vm797_vm0, %v938_v38 }
 0x299   : > { %v922_v39 = vpop.f32.mrf.mxu3 }
 0x29a   : > { %v930_v3 = vmul.f32 %v2312_v0, %v922_v39 }
 0x2a1   : > { %v959_v40 = vpop.f32.mrf.mxu3 }
 0x2a2   : > { %v962_v41 = vperm.slane %v959_v40, 0 }
 0x2a4   : > { %v963_v43 = vadd.f32 %v962_v41, %v937_v42 }
 0x2a6   : > { %vm964_vm9 = vcmp.gt.f32.partialorder %v963_v43, 0.0  ;;  %v965_v44 = vmul.f32 0.2, %v963_v43 }
 0x2a8   : > { %v966_v45 = vsel %vm964_vm9, %v963_v43, %v965_v44 }
 0x2a9   : > { %v967_v46 = vsel %vm792_vm3, %v966_v45, -1e+30 }
 0x2aa   : > { %v968_v47 = vsel %vm885_vm5, %v967_v46, -inf }
 0x2ab   : > { %969 = vmax.xlane.f32.xlu2 %v968_v47 }
 0x31e   : > { %v970_v48 = vpop.xlane.xlu2 %969 }
 0x31f   : > { %v971_v49 = vsub.f32 %v967_v46, %v970_v48 }
 0x321   : > { %v972_v50 = vmul.f32 1.442695, %v971_v49 }
 0x323   : > { %2008 = vpow2.f32 %v972_v50 }
 0x329   : > { %v2009_v51 = vpop.eup %2008 }
 0x32a   : > { %v974_v52 = vsel %vm885_vm5, %v2009_v51, 0.0 }
 0x32b   : > { %975 = vadd.xlane.f32.xlu2 %v974_v52 }
 0x39e   : > { %v976_v53 = vpop.xlane.xlu2 %975 }
 0x39f   : > { %2010 = vrcp.f32 %v976_v53 }
 0x3a5   : > { %v2011_v54 = vpop.eup %2010 }
 0x3a6   : > { %v978_v55 = vmul.f32 %v2011_v54, %v2009_v51 }
 0x3a8   : > { %1938 = vmatmul.msk.f32.vlgmr.msrb.gmra.mxu2 %vm897_vm8, %v978_v55 }
 0x42b   : > { %v999_v2 = vpop.f32.mrf.mxu2 }
 0x42c   : > { %v1007_v5 = vmul.f32 %v2315_v1, %v999_v2  ;;  %v1260_v2 = vld [vmem:[%s2567_s12 + $0x8] sm:$0xff] }
 0x42e   : > { %v1008_v6 = vadd.f32 %v1007_v5, %v930_v3  ;;  %v1232_v3 = vld [vmem:[%s2565_s10] sm:$0xff] }
 0x42f   : > { %v1259_v5 = vld [vmem:[%s2567_s12] sm:$0xff] }
 0x430   : > { %v1012_v12 = vadd.f32 %v1010_v11, %v1008_v6 }
 0x432   : > { %v1017_v7 = vadd.f32 %v1995_v10, %v1012_v12 }
 0x434   : > { %v1019_v13 = vmin.f32 %v1017_v7, 0.0  ;;  %vm1018_vm14 = vcmp.gt.f32.partialorder %v1017_v7, 0.0 }
 0x436   : > { %v1020_v14 = vmul.f32 1.442695, %v1019_v13  ;;  %v1996_v13 = vld [vmem:[%s2614_s1] ss:$0 sm:$0xff] }
 0x438   : > { %2012 = vpow2.f32 %v1020_v14 }
 0x43e   : > { %v2013_v15 = vpop.eup %2012 }
 0x43f   : > { %v1940_v17 = vadd.f32 -1.0, %v2013_v15 }
 0x441   : > { %v1023_v8 = vsel %vm1018_vm14, %v1017_v7, %v1940_v17 }
 0x442   : > { %1941 = vmatmul.msk.f32.vlgmr.msrb.gmra.mxu0 %vm797_vm0, %v1023_v8  ;;  %1942 = vmatmul.msk.f32.vlgmr.msra.gmra.mxu3 %vm797_vm0, %v1023_v8 }
 0x443   : > { %1943 = vmatpush.xpose.msk.msrb.mxu3 %vm797_vm0, %v1023_v8  ;;  %1947 = vmatpush.xpose.msk.msra.mxu0 %vm797_vm0, %v1023_v8 }
 0x447   : > { %1251 = vmatpush.msra.mxu3 %v1235_v59 }
 0x449   : > { %1252 = vmatpush.msra.mxu3 %v1234_v61 }
 0x44a   : > { %1944 = vmatmul.msk.f32.vlgmr.msrb.gmra.mxu3 %vm797_vm0, %v1079_v18  ;;  %1948 = vmatmul.msk.f32.vlgmr.msra.gmra.mxu0 %vm797_vm0, %v1151_v19 }
 0x44b   : > { %1253 = vmatpush.msra.mxu3 %v1233_v63 }
 0x44d   : > { %1254 = vmatpush.msra.mxu3 %v1232_v3 }
 0x4bf   : > { %v1048_v20 = vpop.f32.mrf.mxu0 }
 0x4c0   : > { %1217 = vrot.lane.b32.xlu0 %v1048_v20, %s2613_s9  ;;  %1945 = vmatpush.msk.msra.mxu2 %vm901_vm7, %v1048_v20 }
 0x4c1   : > { %1949 = vmatpush.msk.msrb.mxu1 %vm901_vm7, %v1048_v20 }
 0x4c2   : > { %1275 = vmatpush.msrb.mxu2 %v1262_v60 }
 0x4c4   : > { %1276 = vmatpush.msrb.mxu2 %v1261_v62 }
 0x4c5   : > { %v1072_v21 = vpop.f32.mrf.mxu3 }
 0x4c6   : > { %v1075_v22 = vmul.f32 %v2234_v9, %v1072_v21  ;;  %v1147_v23 = vmul.f32 %v2265_v31, %v1072_v21  ;;  %1277 = vmatpush.msrb.mxu2 %v1260_v2 }
 0x4c7   : > { %v1172_v27 = vpop.f32.mrf.mxu0 }
 0x4c8   : > { %v1148_v24 = vsel %vm851_vm2, %v1147_v23, 0.0  ;;  %v1076_v25 = vsel %vm851_vm2, %v1075_v22, 0.0  ;;  %v1175_v29 = vperm.slane %v1172_v27, 0  ;;  %1278 = vmatpush.msrb.mxu2 %v1259_v5  ;;  %v1463_v5 = vld [vmem:[%s2570_s15 + $0x18] sm:$0xff] }
 0x4c9   : > { %1149 = vadd.xlane.f32.xlu2 %v1148_v24  ;;  %1077 = vadd.xlane.f32.xlu1 %v1076_v25 }
 0x4cd   : > { %v1100_v26 = vpop.f32.mrf.mxu3 }
 0x4ce   : > { %v1103_v28 = vperm.slane %v1100_v26, 0 }
 0x532   : > { %v1218_v14 = vpop.permute.xlu0 %1217 }
 0x53c   : > { %v1150_v30 = vpop.xlane.xlu2 %1149  ;;  %v1078_v32 = vpop.xlane.xlu1 %1077 }
 0x53d   : > { %v1176_v33 = vadd.f32 %v1175_v29, %v1150_v30  ;;  %v1104_v34 = vadd.f32 %v1103_v28, %v1078_v32  ;;  %v1439_v28 = vld [vmem:[%s2569_s14 + $0x18] sm:$0xff]  ;;  %v1438_v29 = vld [vmem:[%s2569_s14 + $0x10] sm:$0xff] }
 0x53f   : > { %v1178_v35 = vmul.f32 0.2, %v1176_v33  ;;  %v1106_v36 = vmul.f32 0.2, %v1104_v34  ;;  %vm1105_vm15 = vcmp.gt.f32.partialorder %v1104_v34, 0.0  ;;  %vm1177_vm1 = vcmp.gt.f32.partialorder %v1176_v33, 0.0 }
 0x541   : > { %v1107_v37 = vsel %vm1105_vm15, %v1104_v34, %v1106_v36  ;;  %v1179_v38 = vsel %vm1177_vm1, %v1176_v33, %v1178_v35 }
 0x542   : > { %v1108_v39 = vsel %vm792_vm3, %v1107_v37, -1e+30  ;;  %v1180_v40 = vsel %vm792_vm3, %v1179_v38, -1e+30 }
 0x543   : > { %v1109_v41 = vsel %vm885_vm5, %v1108_v39, -inf  ;;  %v1181_v42 = vsel %vm885_vm5, %v1180_v40, -inf }
 0x544   : > { %1110 = vmax.xlane.f32.xlu1 %v1109_v41  ;;  %1182 = vmax.xlane.f32.xlu2 %v1181_v42 }
 0x5b7   : > { %v1111_v43 = vpop.xlane.xlu1 %1110  ;;  %v1183_v44 = vpop.xlane.xlu2 %1182 }
 0x5b8   : > { %v1112_v45 = vsub.f32 %v1108_v39, %v1111_v43  ;;  %v1184_v46 = vsub.f32 %v1180_v40, %v1183_v44 }
 0x5ba   : > { %v1113_v47 = vmul.f32 1.442695, %v1112_v45  ;;  %v1185_v48 = vmul.f32 1.442695, %v1184_v46 }
 0x5bc   : > { %2014 = vpow2.f32 %v1113_v47 }
 0x5bd   : > { %2016 = vpow2.f32 %v1185_v48 }
 0x5c2   : > { %v2015_v49 = vpop.eup %2014 }
 0x5c3   : > { %v2017_v50 = vpop.eup %2016  ;;  %v1115_v51 = vsel %vm885_vm5, %v2015_v49, 0.0 }
 0x5c4   : > { %1116 = vadd.xlane.f32.xlu1 %v1115_v51  ;;  %v1187_v52 = vsel %vm885_vm5, %v2017_v50, 0.0 }
 0x5c5   : > { %1188 = vadd.xlane.f32.xlu2 %v1187_v52 }
 0x637   : > { %v1117_v53 = vpop.xlane.xlu1 %1116 }
 0x638   : > { %2018 = vrcp.f32 %v1117_v53  ;;  %v1189_v54 = vpop.xlane.xlu2 %1188 }
 0x639   : > { %2020 = vrcp.f32 %v1189_v54 }
 0x63e   : > { %v2019_v55 = vpop.eup %2018 }
 0x63f   : > { %v2021_v56 = vpop.eup %2020  ;;  %v1119_v57 = vmul.f32 %v2019_v55, %v2015_v49 }
 0x640   : > { %v1191_v58 = vmul.f32 %v2021_v56, %v2017_v50 }
 0x641   : > { %1946 = vmatmul.msk.f32.vlgmr.msra.gmra.mxu2 %vm897_vm8, %v1119_v57 }
 0x642   : > { %1950 = vmatmul.msk.f32.vlgmr.msrb.gmra.mxu1 %vm897_vm8, %v1191_v58 }
 0x6bf   : > { %v1212_v6 = vpop.f32.mrf.mxu1 }
 0x6c0   : > { %v1215_v11 = vmul.f32 %v2315_v1, %v1212_v6  ;;  %v1332_v1 = vld [vmem:[%s2566_s11 + $0x1] sm:$0x1]  ;;  %v1462_v6 = vld [vmem:[%s2570_s15 + $0x10] sm:$0xff] }
 0x6c4   : > { %v1143_v10 = vpop.f32.mrf.mxu2 }
 0x6c5   : > { %v1146_v12 = vmul.f32 %v2312_v0, %v1143_v10  ;;  %v1287_v0 = vld [vmem:[%s2566_s11] sm:$0x1]  ;;  %v1461_v10 = vld [vmem:[%s2570_s15 + $0x8] sm:$0xff] }
 0x6c7   : > { %v1216_v7 = vadd.f32 %v1215_v11, %v1146_v12  ;;  %v1460_v11 = vld [vmem:[%s2570_s15] sm:$0xff] }
 0x6c9   : > { %v1220_v15 = vadd.f32 %v1218_v14, %v1216_v7 }
 0x6cb   : > { %v1225_v17 = vadd.f32 %v1996_v13, %v1220_v15 }
 0x6cd   : > { %v1227_v8 = vmin.f32 %v1225_v17, 0.0  ;;  %vm1226_vm4 = vcmp.gt.f32.partialorder %v1225_v17, 0.0 }
 0x6cf   : > { %v1228_v18 = vmul.f32 1.442695, %v1227_v8 }
 0x6d1   : > { %2022 = vpow2.f32 %v1228_v18 }
 0x6d7   : > { %v2023_v19 = vpop.eup %2022 }
 0x6d8   : > { %v1951_v20 = vadd.f32 -1.0, %v2023_v19 }
 0x6da   : > { %v1231_v21 = vsel %vm1226_vm4, %v1225_v17, %v1951_v20  ;;  %v1997_v17 = vld [vmem:[%s2568_s13] ss:$0 sm:$0xff] }
 0x6db   : > { %1952 = vmatmul.msk.f32.vlgmr.msra.gmra.mxu3 %vm797_vm0, %v1231_v21  ;;  %1953 = vmatmul.msk.f32.vlgmr.msrb.gmra.mxu2 %vm797_vm0, %v1231_v21 }
 0x6dc   : > { %1954 = vmatpush.xpose.msk.msrb.mxu0 %vm797_vm0, %v1231_v21  ;;  %1956 = vmatpush.xpose.msk.msra.mxu1 %vm797_vm0, %v1231_v21 }
 0x6df   : > { %1955 = vmatmul.msk.f32.vlgmr.msrb.gmra.mxu0 %vm797_vm0, %v1287_v0  ;;  %1957 = vmatmul.msk.f32.vlgmr.msra.gmra.mxu1 %vm797_vm0, %v1332_v1 }
 0x6e0   : > { %1452 = vmatpush.msra.mxu0 %v1439_v28  ;;  %1483 = vmatpush.msrb.mxu1 %v1463_v5  ;;  %v1716_v5 = vld [vmem:[%s2573_s18] sm:$0xff] }
 0x6e2   : > { %1453 = vmatpush.msra.mxu0 %v1438_v29  ;;  %1484 = vmatpush.msrb.mxu1 %v1462_v6  ;;  %v1755_v6 = vld [vmem:[%s2575_s20 + $0x38] sm:$0xff] }
 0x6e4   : > { %1485 = vmatpush.msrb.mxu1 %v1461_v10  ;;  %v1754_v10 = vld [vmem:[%s2575_s20 + $0x30] sm:$0xff] }
 0x6e6   : > { %1486 = vmatpush.msrb.mxu1 %v1460_v11  ;;  %v1753_v11 = vld [vmem:[%s2575_s20 + $0x28] sm:$0xff] }
 0x75c   : > { %v1308_v30 = vpop.f32.mrf.mxu0  ;;  %v1353_v32 = vpop.f32.mrf.mxu1 }
 0x75d   : > { %v1311_v33 = vperm.slane %v1308_v30, 0  ;;  %v1356_v34 = vperm.slane %v1353_v32, 0 }
 0x75e   : > { %v1256_v22 = vpop.f32.mrf.mxu3  ;;  %v1280_v23 = vpop.f32.mrf.mxu2 }
 0x75f   : > { %v1283_v24 = vmul.f32 %v2234_v9, %v1280_v23  ;;  %v1328_v25 = vmul.f32 %v2265_v31, %v1280_v23  ;;  %1960 = vmatpush.msk.msra.mxu2 %vm901_vm7, %v1256_v22  ;;  %v1437_v9 = vld [vmem:[%s2569_s14 + $0x8] sm:$0xff]  ;;  %v1436_v31 = vld [vmem:[%s2569_s14] sm:$0xff] }
 0x760   : > { %1454 = vmatpush.msra.mxu0 %v1437_v9 }
 0x761   : > { %v1329_v26 = vsel %vm851_vm2, %v1328_v25, 0.0  ;;  %v1284_v27 = vsel %vm851_vm2, %v1283_v24, 0.0 }
 0x762   : > { %1330 = vadd.xlane.f32.xlu2 %v1329_v26  ;;  %1285 = vadd.xlane.f32.xlu1 %v1284_v27 }
 0x763   : > { %1455 = vmatpush.msra.mxu0 %v1436_v31 }
 0x764   : > { %1962 = vmatmul.msk.f32.vlgmr.msra.gmra.mxu0 %vm797_vm0, %v2220_v4 }
 0x7d5   : > { %v1331_v35 = vpop.xlane.xlu2 %1330  ;;  %v1286_v36 = vpop.xlane.xlu1 %1285 }
 0x7d6   : > { %v1357_v37 = vadd.f32 %v1356_v34, %v1331_v35  ;;  %v1312_v38 = vadd.f32 %v1311_v33, %v1286_v36 }
 0x7d8   : > { %v1359_v39 = vmul.f32 0.2, %v1357_v37  ;;  %v1314_v40 = vmul.f32 0.2, %v1312_v38  ;;  %vm1358_vm2 = vcmp.gt.f32.partialorder %v1357_v37, 0.0  ;;  %vm1313_vm6 = vcmp.gt.f32.partialorder %v1312_v38, 0.0 }
 0x7da   : > { %v1360_v41 = vsel %vm1358_vm2, %v1357_v37, %v1359_v39  ;;  %v1315_v42 = vsel %vm1313_vm6, %v1312_v38, %v1314_v40  ;;  %v1465_v38 = vld [vmem:[%s2570_s15 + $0x28] sm:$0xff]  ;;  %v1464_v40 = vld [vmem:[%s2570_s15 + $0x20] sm:$0xff] }
 0x7db   : > { %v1361_v43 = vsel %vm792_vm3, %v1360_v41, -1e+30  ;;  %v1316_v44 = vsel %vm792_vm3, %v1315_v42, -1e+30  ;;  %vm1495_vm3 = vcmask 130048   ;;  %1577 = vmatpush.msrb.mxu0 %v1465_v38  ;;  %v1467_v41 = vld [vmem:[%s2570_s15 + $0x38] sm:$0xff] }
 0x7dc   : > { %v1362_v45 = vsel %vm885_vm5, %v1361_v43, -inf  ;;  %v1317_v46 = vsel %vm885_vm5, %v1316_v44, -inf }
 0x7dd   : > { %1363 = vmax.xlane.f32.xlu1 %v1362_v45  ;;  %1318 = vmax.xlane.f32.xlu0 %v1317_v46  ;;  %v1466_v45 = vld [vmem:[%s2570_s15 + $0x30] sm:$0xff] }
 0x7de   : > { %1578 = vmatpush.msrb.mxu0 %v1464_v40 }
 0x7e1   : > { %v2419_v56 = vpop.f32.mrf.mxu0 }
 0x7e2   : > { %v1491_v57 = vmul.f32 0.25, %v2419_v56 }
 0x7f1   : > { %1586 = vrot.lane.b32.xlu0 %v2419_v56, %s2056_s7 }
 0x850   : > { %v1319_v47 = vpop.xlane.xlu0 %1318  ;;  %v1364_v48 = vpop.xlane.xlu1 %1363 }
 0x851   : > { %v1320_v49 = vsub.f32 %v1316_v44, %v1319_v47  ;;  %v1365_v50 = vsub.f32 %v1361_v43, %v1364_v48 }
 0x853   : > { %v1321_v51 = vmul.f32 1.442695, %v1320_v49  ;;  %v1366_v52 = vmul.f32 1.442695, %v1365_v50 }
 0x855   : > { %2024 = vpow2.f32 %v1321_v51 }
 0x856   : > { %2026 = vpow2.f32 %v1366_v52 }
 0x85b   : > { %v2025_v53 = vpop.eup %2024 }
 0x85c   : > { %v2027_v54 = vpop.eup %2026  ;;  %v1323_v55 = vsel %vm885_vm5, %v2025_v53, 0.0 }
 0x85d   : > { %1324 = vadd.xlane.f32.xlu2 %v1323_v55  ;;  %v1368_v16 = vsel %vm885_vm5, %v2027_v54, 0.0 }
 0x85e   : > { %1369 = vadd.xlane.f32.xlu1 %v1368_v16 }
 0x863   : > { %v1587_v12 = vpop.permute.xlu0 %1586 }
 0x864   : > { %1969 = vmatpush.xpose.msk.msra.mxu1 %vm1495_vm3, %v1587_v12 }
 0x875   : > { %1374 = vrot.lane.b32.xlu2 %v1256_v22, %s2613_s9 }
 0x877   : > { %1427 = vrot.lane.b32.xlu1 %v1256_v22, %s2057_s26 }
 0x87d   : > { %1493 = vrot.lane.b32.xlu2 %v2419_v56, %s2613_s9  ;;  %s2059_s9 = smov 48  }
 0x885   : > { %1584 = vrot.lane.b32.xlu2 %v1491_v57, %s2058_s0 }
 0x8d0   : > { %v1325_v58 = vpop.xlane.xlu2 %1324 }
 0x8d1   : > { %2028 = vrcp.f32 %v1325_v58  ;;  %v1370_v59 = vpop.xlane.xlu1 %1369 }
 0x8d2   : > { %2030 = vrcp.f32 %v1370_v59 }
 0x8d7   : > { %v2029_v60 = vpop.eup %2028 }
 0x8d8   : > { %v2031_v61 = vpop.eup %2030  ;;  %v1327_v62 = vmul.f32 %v2029_v60, %v2025_v53  ;;  %v1375_v63 = vpop.permute.xlu2 %1374  ;;  %v2060_v53 = vmov 32.0  }
 0x8d9   : > { %v1372_v2 = vmul.f32 %v2031_v61, %v2027_v54  ;;  %1958 = vmatpush.msk.msrb.mxu3 %vm901_vm7, %v1375_v63  ;;  %v1719_v63 = vld [vmem:[%s2573_s18 + $0x18] sm:$0xff] }
 0x8da   : > { %1961 = vmatmul.msk.f32.vlgmr.msra.gmra.mxu2 %vm897_vm8, %v1327_v62  ;;  %1739 = vmatpush.msra.mxu0 %v1719_v63 }
 0x8db   : > { %1959 = vmatmul.msk.f32.vlgmr.msrb.gmra.mxu3 %vm897_vm8, %v1372_v2  ;;  %v1718_v2 = vld [vmem:[%s2573_s18 + $0x10] sm:$0xff] }
 0x8dc   : > { %1740 = vmatpush.msra.mxu0 %v1718_v2 }
 0x8e0   : > { %v1494_v3 = vpop.permute.xlu2 %1493 }
 0x8e1   : > { %1964 = vmatpush.xpose.msk.msra.mxu3 %vm1495_vm3, %v1494_v3  ;;  %v1717_v3 = vld [vmem:[%s2573_s18 + $0x8] sm:$0xff] }
 0x8e2   : > { %1741 = vmatpush.msra.mxu0 %v1717_v3 }
 0x8e4   : > { %1965 = vmatmul.msk.f32.vlgmr.msra.gmra.mxu3 %vm1495_vm3, %v1491_v57  ;;  %1742 = vmatpush.msra.mxu0 %v1716_v5 }
 0x8e8   : > { %v1585_v0 = vpop.permute.xlu2 %1584 }
 0x8e9   : > { %v1428_v8 = vpop.permute.xlu1 %1427 }
 0x95d   : > { %v1423_v7 = vpop.f32.mrf.mxu2 }
 0x95e   : > { %v1398_v13 = vpop.f32.mrf.mxu3 }
 0x95f   : > { %v1424_v14 = vadd.f32 %v1423_v7, %v1398_v13  ;;  %v1752_v13 = vld [vmem:[%s2575_s20 + $0x20] sm:$0xff] }
 0x961   : > { %v1426_v15 = vmul.f32 0.5, %v1424_v14 }
 0x963   : > { %v1430_v18 = vadd.f32 %v1428_v8, %v1426_v15  ;;  %v1751_v15 = vld [vmem:[%s2575_s20 + $0x18] sm:$0xff] }
 0x965   : > { %v1435_v19 = vadd.f32 %v1997_v17, %v1430_v18 }
 0x967   : > { %1963 = vmatmul.msk.f32.vlgmr.msrb.gmra.mxu1 %vm797_vm0, %v1435_v19  ;;  %v1518_v20 = vpop.f32.mrf.mxu3 }
 0x968   : > { %v1521_v21 = vsel %vm885_vm5, %v1518_v20, -inf  ;;  %1772 = vmatpush.msrb.mxu1 %v1755_v6 }
 0x969   : > { %1522 = vmax.xlane.f32.xlu2 %v1521_v21 }
 0x96a   : > { %1773 = vmatpush.msrb.mxu1 %v1754_v10 }
 0x96c   : > { %1774 = vmatpush.msrb.mxu1 %v1753_v11 }
 0x96e   : > { %1775 = vmatpush.msrb.mxu1 %v1752_v13 }
 0x96f   : > { %1970 = vmatmul.msk.f32.vlgmr.msra.gmra.mxu1 %vm1495_vm3, %v1585_v0  ;;  %v1998_v0 = vld [vmem:[%s2571_s16] ss:$0 sm:$0xff] }
 0x970   : > { %1776 = vmatpush.msrb.mxu1 %v1751_v15 }
 0x981   : > { %1625 = vrot.lane.b32.xlu2 %v2419_v56, %s2059_s9 }
 0x9dc   : > { %v1523_v1 = vpop.xlane.xlu2 %1522 }
 0x9dd   : > { %v1524_v22 = vsub.f32 %v1518_v20, %v1523_v1 }
 0x9df   : > { %v1525_v25 = vmul.f32 1.442695, %v1524_v22 }
 0x9e1   : > { %2032 = vpow2.f32 %v1525_v25 }
 0x9e4   : > { %v1488_v23 = vpop.f32.mrf.mxu1  ;;  %v1626_v24 = vpop.permute.xlu2 %1625 }
 0x9e5   : > { %1972 = vmatpush.msk.msrb.mxu3 %vm901_vm7, %v1626_v24  ;;  %v1489_v48 = vadd.f32 %v1488_v23, %v2220_v4  ;;  %v1999_v23 = vld [vmem:[%s2572_s17] ss:$0 sm:$0xff] }
 0x9e7   : > { %v2033_v28 = vpop.eup %2032 }
 0x9e8   : > { %v1527_v29 = vsel %vm885_vm5, %v2033_v28, 0.0 }
 0x9ec   : > { %v1609_v26 = vpop.f32.mrf.mxu1 }
 0x9ed   : > { %v1612_v27 = vsel %vm885_vm5, %v1609_v26, -inf }
 0x9ee   : > { %1613 = vmax.xlane.f32.xlu1 %v1612_v27  ;;  %v1749_v27 = vld [vmem:[%s2575_s20 + $0x8] sm:$0xff] }
 0x9f6   : > { %1528 = vadd.xlane.f32.xlu1 %v1527_v29  ;;  %v2000_v29 = vld [vmem:[%s2574_s19] ss:$0 sm:$0xff] }
 0xa0f   : > { %1533 = vrot.lane.b32.xlu1 %v2419_v56, %s2057_s26 }
 0xa61   : > { %v1614_v9 = vpop.xlane.xlu1 %1613 }
 0xa62   : > { %v1615_v31 = vsub.f32 %v1609_v26, %v1614_v9  ;;  %v1750_v26 = vld [vmem:[%s2575_s20 + $0x10] sm:$0xff] }
 0xa63   : > { %1777 = vmatpush.msrb.mxu1 %v1750_v26 }
 0xa64   : > { %v1616_v30 = vmul.f32 1.442695, %v1615_v31 }
 0xa65   : > { %1778 = vmatpush.msrb.mxu1 %v1749_v27 }
 0xa66   : > { %2034 = vpow2.f32 %v1616_v30 }
 0xa69   : > { %v1529_v32 = vpop.xlane.xlu1 %1528 }
 0xa6a   : > { %2036 = vrcp.f32 %v1529_v32  ;;  %v2001_v32 = vld [vmem:[%s2576_s21] ss:$0 sm:$0xff] }
 0xa6c   : > { %v2035_v33 = vpop.eup %2034 }
 0xa6d   : > { %v1618_v34 = vsel %vm885_vm5, %v2035_v33, 0.0 }
 0xa6e   : > { %1619 = vadd.xlane.f32.xlu0 %v1618_v34 }
 0xa70   : > { %v2037_v35 = vpop.eup %2036 }
 0xa71   : > { %v1531_v36 = vmul.f32 %v2037_v35, %v2033_v28  ;;  %v1748_v28 = vld [vmem:[%s2575_s20] sm:$0xff] }
 0xa72   : > { %1779 = vmatpush.msrb.mxu1 %v1748_v28 }
 0xa73   : > { %1532 = vst.msk [vmem:[%s789_s27] sm:$0x7f] %vm885_vm5, %v1531_v36 }
 0xa81   : > { %v1534_v37 = vpop.permute.xlu1 %1533 }
 0xa82   : > { %1966 = vmatpush.msk.msrb.mxu2 %vm901_vm7, %v1534_v37  ;;  %vm1678_vm7 = vcmask 260096  }
 0xa83   : > { %1967 = vmatmul.msk.f32.vlgmr.msrb.gmra.mxu2 %vm897_vm8, %v1531_v36 }
 0xa84   : > { %1669 = vmatpush.msra.mxu2 %v1467_v41 }
 0xa86   : > { %1670 = vmatpush.msra.mxu2 %v1466_v45 }
 0xae1   : > { %v1620_v39 = vpop.xlane.xlu0 %1619 }
 0xae2   : > { %2038 = vrcp.f32 %v1620_v39 }
 0xae3   : > { %2040 = vrcp.f32 %v2060_v53  ;;  %v2003_v53 = vld [vmem:[%s2578_s23] ss:$0 sm:$0xff] }
 0xae8   : > { %v2039_v42 = vpop.eup %2038 }
 0xae9   : > { %v1622_v43 = vmul.f32 %v2039_v42, %v2035_v33  ;;  %v2041_v54 = vpop.eup %2040 }
 0xaea   : > { %v1683_v55 = vmul.f32 32.0, %v2041_v54 }
 0xaeb   : > { %1971 = vst.msk [vmem:[%s789_s27 + $0x8] sm:$0x7f] %vm885_vm5, %v1622_v43  ;;  %1973 = vmatmul.msk.f32.vlgmr.msrb.gmra.mxu3 %vm897_vm8, %v1622_v43  ;;  %vm1687_vm5 = vweird.f32 %v2041_v54 }
 0xaec   : > { %v1684_v16 = vsub.f32 1.0, %v1683_v55 }
 0xaee   : > { %v1685_v56 = vmul.f32 %v2041_v54, %v1684_v16 }
 0xaf0   : > { %v1686_v57 = vadd.f32 %v2041_v54, %v1685_v56 }
 0xaf2   : > { %v2483_v58 = vsel %vm1687_vm5, %v2041_v54, %v1686_v57 }
 0xb06   : > { %v1557_v44 = vpop.f32.mrf.mxu2 }
 0xb07   : > { %1968 = vmatmul.msk.f32.vlgmr.msrb.gmra.mxu0 %vm1495_vm3, %v1557_v44 }
 0xb6e   : > { %v1649_v46 = vpop.f32.mrf.mxu3 }
 0xb6f   : > { %1974 = vmatmul.msk.f32.vlgmr.msra.gmra.mxu2 %vm1495_vm3, %v1649_v46 }
 0xb84   : > { %v1580_v47 = vpop.f32.mrf.mxu0 }
 0xb85   : > { %v1583_v49 = vadd.f32 %v1580_v47, %v1489_v48 }
 0xbf2   : > { %v1672_v50 = vpop.f32.mrf.mxu2 }
 0xbf3   : > { %v1675_v51 = vadd.f32 %v1672_v50, %v1583_v49 }
 0xbf5   : > { %v1679_v52 = vsel %vm1678_vm7, %v1675_v51, 0.0 }
 0xbf6   : > { %1680 = vadd.xlane.f32.xlu0 %v1679_v52 }
 0xc69   : > { %v1681_v59 = vpop.xlane.xlu0 %1680 }
 0xc6a   : > { %v1689_v4 = vmul.f32 %v2483_v58, %v1681_v59 }
 0xc6c   : > { %v1690_v60 = vsub.f32 %v1675_v51, %v1689_v4  ;;  %v2002_v51 = vld [vmem:[%s2577_s22] ss:$0 sm:$0xff] }
 0xc6e   : > { %v1691_v61 = vmul.f32 %v1690_v60, %v1690_v60 }
 0xc70   : > { %v1692_v62 = vsel %vm1678_vm7, %v1691_v61, 0.0 }
 0xc71   : > { %1693 = vadd.xlane.f32.xlu0 %v1692_v62 }
 0xce4   : > { %v1694_v12 = vpop.xlane.xlu0 %1693 }
 0xce5   : > { %v1695_v7 = vmul.f32 %v1694_v12, %v2483_v58 }
 0xce7   : > { %v1696_v14 = vadd.f32 1e-06, %v1695_v7 }
 0xce9   : > { %2042 = vrsqrt.f32 %v1696_v14  ;;  %vm1703_vm9 = vweird.f32 %v1696_v14 }
 0xcef   : > { %v2043_v17 = vpop.eup %2042 }
 0xcf0   : > { %v1698_v8 = vmul.f32 %v2043_v17, %v1696_v14  ;;  %vm1704_vm8 = vweird.f32 %v2043_v17 }
 0xcf1   : > { %vm1705_vm10 = vmor %vm1703_vm9, %vm1704_vm8 }
 0xcf2   : > { %v1699_v18 = vmul.f32 %v2043_v17, %v1698_v8 }
 0xcf4   : > { %v1700_v19 = vmul.f32 0.5, %v1699_v18 }
 0xcf6   : > { %v1701_v20 = vsub.f32 1.5, %v1700_v19 }
 0xcf8   : > { %v1702_v21 = vmul.f32 %v2043_v17, %v1701_v20 }
 0xcfa   : > { %v1706_v1 = vsel %vm1705_vm10, %v2043_v17, %v1702_v21 }
 0xcfb   : > { %v1707_v22 = vmul.f32 %v1706_v1, %v1690_v60 }
 0xcfd   : > { %v1711_v24 = vmul.f32 %v1998_v0, %v1707_v22 }
 0xcff   : > { %v1715_v25 = vadd.f32 %v1999_v23, %v1711_v24 }
 0xd01   : > { %1975 = vmatmul.msk.f32.vlgmr.msra.gmra.mxu0 %vm797_vm0, %v1715_v25  ;;  %vm1760_vm0 = vcmask 523264  }
 0xd7e   : > { %v1744_v9 = vpop.f32.mrf.mxu0 }
 0xd7f   : > { %v1745_v31 = vadd.f32 %v2000_v29, %v1744_v9 }
 0xd81   : > { %v1747_v30 = vmax.f32 %v1745_v31, 0.0 }
 0xd83   : > { %1976 = vmatmul.msk.f32.vlgmr.msrb.gmra.mxu1 %vm1760_vm0, %v1747_v30 }
 0xe00   : > { %v1781_v33 = vpop.f32.mrf.mxu1 }
 0xe01   : > { %v1782_v34 = vadd.f32 %v2001_v32, %v1781_v33 }
 0xe03   : > { %v1784_v35 = vadd.f32 %v1782_v34, %v1715_v25 }
 0xe05   : > { %v1787_v36 = vsel %vm1678_vm7, %v1784_v35, 0.0 }
 0xe06   : > { %1788 = vadd.xlane.f32.xlu2 %v1787_v36 }
 0xe79   : > { %v1789_v37 = vpop.xlane.xlu2 %1788 }
 0xe7a   : > { %v1790_v38 = vmul.f32 %v1789_v37, %v2483_v58 }
 0xe7c   : > { %v1791_v39 = vsub.f32 %v1784_v35, %v1790_v38 }
 0xe7e   : > { %v1792_v40 = vmul.f32 %v1791_v39, %v1791_v39 }
 0xe80   : > { %v1793_v41 = vsel %vm1678_vm7, %v1792_v40, 0.0 }
 0xe81   : > { %1794 = vadd.xlane.f32.xlu0 %v1793_v41 }
 0xef4   : > { %v1795_v42 = vpop.xlane.xlu0 %1794 }
 0xef5   : > { %v1796_v43 = vmul.f32 %v1795_v42, %v2483_v58 }
 0xef7   : > { %v1797_v44 = vadd.f32 1e-06, %v1796_v43 }
 0xef9   : > { %2044 = vrsqrt.f32 %v1797_v44  ;;  %vm1804_vm12 = vweird.f32 %v1797_v44 }
 0xeff   : > { %v2045_v45 = vpop.eup %2044 }
 0xf00   : > { %v1799_v46 = vmul.f32 %v2045_v45, %v1797_v44  ;;  %vm1805_vm11 = vweird.f32 %v2045_v45 }
 0xf01   : > { %vm1806_vm13 = vmor %vm1804_vm12, %vm1805_vm11 }
 0xf02   : > { %v1800_v47 = vmul.f32 %v2045_v45, %v1799_v46 }
 0xf04   : > { %v1801_v48 = vmul.f32 0.5, %v1800_v47 }
 0xf06   : > { %v1802_v49 = vsub.f32 1.5, %v1801_v48 }
 0xf08   : > { %v1803_v50 = vmul.f32 %v2045_v45, %v1802_v49 }
 0xf0a   : > { %v1807_v52 = vsel %vm1806_vm13, %v2045_v45, %v1803_v50 }
 0xf0b   : > { %v1808_v54 = vmul.f32 %v1807_v52, %v1791_v39 }
 0xf0d   : > { %v1812_v55 = vmul.f32 %v2002_v51, %v1808_v54 }
 0xf0f   : > { %v1816_v16 = vadd.f32 %v2003_v53, %v1812_v55 }
 0xf11   : > { %1817 = vst.msk [vmem:[%s784_s3] sm:$0x7f] %vm1678_vm7, %v1816_v16 }
 0xf12 PF: > { %s36_s29 = sadd.s32 1, %s2052_s29  }
 0xf13   : > { %p33_p4 = scmp.ge.s32.totalorder %s36_s29, 4  }
 0xf15   :  { %35 = sbr.rel (!%p33_p4) target bundleno = 11 (0xb), region = 162 }

</bundles_post_ra>
